<compile_context>
chip_gen: v5e
topology: v5e:2x2
jax: 0.10.0
libtpu: 0.0.40
codegen_flags: <defaults>
</compile_context>

<pallas_src>
import functools

import jax
import jax.numpy as jnp
from jax.experimental import pallas as pl
from jax.experimental.pallas import tpu as pltpu


VMEM_LIMIT = 48 * 1024 * 1024   # explicit scoped-VMEM budget (fits v7x's 64 MiB)


def _round_up(x, m):
    return (x + m - 1) // m * m


def _pick_tile_m(m_real, target):
    """Largest balanced M tile <= target, multiple of 16, minimal overshoot."""
    m16 = _round_up(m_real, 16)
    if m16 <= target:
        return m16
    n_tiles = -(-m_real // target)               # ceil
    return _round_up(-(-m_real // n_tiles), 16)  # balanced tile, 16-aligned


# ---------------------------------------------------------------------------
# Kernel 1: matmul + activation (layers without BatchNorm)
# ---------------------------------------------------------------------------
def _conv_act_kernel(p_ref, w_ref, o_ref, *, act):
    # p_ref: (TILE_M, K) bf16 ; w_ref: (K, Cout) bf16 ; f32 accumulation on MXU.
    y = jnp.dot(p_ref[...], w_ref[...], preferred_element_type=jnp.float32)
    if act == "leaky":
        y = jnp.where(y > 0.0, y, 0.2 * y)           # LeakyReLU(0.2)
    else:
        y = 1.0 / (1.0 + jnp.exp(-y))                # exact sigmoid (tiny layer)
    o_ref[...] = y.astype(o_ref.dtype)


def conv_act(patches, w_mat, *, tile_m, act, out_dtype):
    m_pad, k = patches.shape
    cout = w_mat.shape[1]
    return pl.pallas_call(
        functools.partial(_conv_act_kernel, act=act),
        out_shape=jax.ShapeDtypeStruct((m_pad, cout), out_dtype),
        grid=(m_pad // tile_m,),
        in_specs=[
            pl.BlockSpec((tile_m, k), lambda i: (i, 0)),
            pl.BlockSpec((k, cout), lambda i: (0, 0)),   # weight stays resident
        ],
        out_specs=pl.BlockSpec((tile_m, cout), lambda i: (i, 0)),
        compiler_params=pltpu.CompilerParams(
            dimension_semantics=("parallel",),
            vmem_limit_bytes=VMEM_LIMIT),
    )(patches, w_mat)


# ---------------------------------------------------------------------------
# Kernel 2: matmul + per-tile partial batch statistics (BN pass 1, parallel)
# ---------------------------------------------------------------------------
def _conv_stats_kernel(p_ref, w_ref, y_ref, psum_ref, psq_ref):
    y = jnp.dot(p_ref[...], w_ref[...], preferred_element_type=jnp.float32)
    y_ref[...] = y.astype(y_ref.dtype)               # bf16 intermediate (6 B/elem)
    # Per-tile partial sums; zero-padded rows contribute nothing.  Each partial is
    # broadcast over 8 rows (sublane-aligned block) and pre-divided by 8 so the
    # consumer can just sum all rows.
    s = jnp.sum(y, axis=0, keepdims=True) * 0.125
    sq = jnp.sum(y * y, axis=0, keepdims=True) * 0.125
    psum_ref[...] = jnp.broadcast_to(s, psum_ref.shape)
    psq_ref[...] = jnp.broadcast_to(sq, psq_ref.shape)


def conv_stats(patches, w_mat, *, tile_m):
    m_pad, k = patches.shape
    cout = w_mat.shape[1]
    n_tiles = m_pad // tile_m
    return pl.pallas_call(
        _conv_stats_kernel,
        out_shape=(
            jax.ShapeDtypeStruct((m_pad, cout), jnp.bfloat16),      # un-normalized y
            jax.ShapeDtypeStruct((n_tiles * 8, cout), jnp.float32),  # partial sums
            jax.ShapeDtypeStruct((n_tiles * 8, cout), jnp.float32),  # partial sum sq
        ),
        grid=(n_tiles,),
        in_specs=[
            pl.BlockSpec((tile_m, k), lambda i: (i, 0)),
            pl.BlockSpec((k, cout), lambda i: (0, 0)),
        ],
        out_specs=(
            pl.BlockSpec((tile_m, cout), lambda i: (i, 0)),
            pl.BlockSpec((8, cout), lambda i: (i, 0)),
            pl.BlockSpec((8, cout), lambda i: (i, 0)),
        ),
        compiler_params=pltpu.CompilerParams(
            dimension_semantics=("parallel",),      # both TCs get work on v7x
            vmem_limit_bytes=VMEM_LIMIT),
    )(patches, w_mat)


# ---------------------------------------------------------------------------
# Kernel 3: reduce partials -> scale/shift, fused FMA + LeakyReLU (BN pass 2)
# ---------------------------------------------------------------------------
def _bn_act_kernel(y_ref, psum_ref, psq_ref, g_ref, b_ref, o_ref, *, inv_m):
    mean = jnp.sum(psum_ref[...], axis=0, keepdims=True) * inv_m    # E[x]
    msq = jnp.sum(psq_ref[...], axis=0, keepdims=True) * inv_m      # E[x^2]
    var = jnp.maximum(msq - mean * mean, 0.0)        # biased var (PyTorch training)
    scale = jax.lax.rsqrt(var + 1e-5) * g_ref[...]
    shift = b_ref[...] - mean * scale
    y = y_ref[...].astype(jnp.float32) * scale + shift              # single FMA
    o_ref[...] = jnp.where(y > 0.0, y, 0.2 * y).astype(o_ref.dtype)


def bn_act(y, psum, psq, gamma, beta, *, tile_m, m_real, out_dtype):
    m_pad, cout = y.shape
    nt8 = psum.shape[0]
    return pl.pallas_call(
        functools.partial(_bn_act_kernel, inv_m=1.0 / float(m_real)),
        out_shape=jax.ShapeDtypeStruct((m_pad, cout), out_dtype),
        grid=(m_pad // tile_m,),
        in_specs=[
            pl.BlockSpec((tile_m, cout), lambda i: (i, 0)),
            pl.BlockSpec((nt8, cout), lambda i: (0, 0)),   # resident partials
            pl.BlockSpec((nt8, cout), lambda i: (0, 0)),
            pl.BlockSpec((1, cout), lambda i: (0, 0)),
            pl.BlockSpec((1, cout), lambda i: (0, 0)),
        ],
        out_specs=pl.BlockSpec((tile_m, cout), lambda i: (i, 0)),
        compiler_params=pltpu.CompilerParams(
            dimension_semantics=("parallel",),
            vmem_limit_bytes=VMEM_LIMIT),
    )(y, psum, psq, gamma, beta)


# ---------------------------------------------------------------------------
# Glue: im2col patch extraction (plain JAX; kh/kw/stride/pad are Python ints)
# ---------------------------------------------------------------------------
def im2col(x_nhwc, kh, kw, stride, pad):
    x = jnp.pad(x_nhwc, ((0, 0), (pad, pad), (pad, pad), (0, 0))) if pad else x_nhwc
    N, H, W, C = x.shape
    out_h = (H - kh) // stride + 1
    out_w = (W - kw) // stride + 1
    cols = []
    for i in range(kh):
        for j in range(kw):
            cols.append(
                x[:, i:i + stride * out_h:stride, j:j + stride * out_w:stride, :])
    patches = jnp.concatenate(cols, axis=-1)          # (N, oh, ow, kh*kw*C)
    return patches.reshape(N * out_h * out_w, kh * kw * C), out_h, out_w


# ---------------------------------------------------------------------------
# Parameter preparation (hoisted out of the forward pass)
# ---------------------------------------------------------------------------
def init_discr_params(key, nc=3, ndf=64, no=1):
    ks = jax.random.split(key, 4)
    scale = 0.05  # deterministic synthetic init (DCGAN uses N(0, 0.02))
    return {
        "w1": jax.random.normal(ks[0], (ndf, nc, 4, 4), jnp.float32) * scale,
        "w2": jax.random.normal(ks[1], (ndf * 2, ndf, 4, 4), jnp.float32) * scale,
        "w3": jax.random.normal(ks[2], (ndf * 4, ndf * 2, 4, 4), jnp.float32) * scale,
        "w4": jax.random.normal(ks[3], (no, ndf * 4, 4, 4), jnp.float32) * scale,
        # BatchNorm2d defaults: gamma=1, beta=0 (training-mode batch stats)
        "g2": jnp.ones((ndf * 2,), jnp.float32),
        "b2": jnp.zeros((ndf * 2,), jnp.float32),
        "g3": jnp.ones((ndf * 4,), jnp.float32),
        "b3": jnp.zeros((ndf * 4,), jnp.float32),
    }


def _prepare_layer(w_oihw, gamma=None, beta=None):
    # (Cout, Cin, kh, kw) -> (K, Cout_pad) bf16, K ordered (kh, kw, cin).
    # K is NOT padded (a full-dim block is legal); only Cout is lane-padded.
    cout, cin, kh, kw = w_oihw.shape
    k_real = kh * kw * cin
    cout_pad = _round_up(max(cout, 128), 128)
    w_mat = jnp.transpose(w_oihw, (2, 3, 1, 0)).reshape(k_real, cout)
    w_mat = jnp.pad(w_mat, ((0, 0), (0, cout_pad - cout)))
    arrays = {"w": w_mat.astype(jnp.bfloat16)}
    meta = {"kh": kh, "kw": kw, "cout": cout}          # static Python ints
    if gamma is not None:
        arrays["g"] = jnp.pad(gamma.reshape(1, -1), ((0, 0), (0, cout_pad - cout)),
                              constant_values=1.0)
        arrays["b"] = jnp.pad(beta.reshape(1, -1), ((0, 0), (0, cout_pad - cout)))
    return arrays, meta


def prepare_discr_params(params):
    arrays, meta = {}, {}
    arrays["l1"], meta["l1"] = _prepare_layer(params["w1"])
    arrays["l2"], meta["l2"] = _prepare_layer(params["w2"], params["g2"], params["b2"])
    arrays["l3"], meta["l3"] = _prepare_layer(params["w3"], params["g3"], params["b3"])
    arrays["l4"], meta["l4"] = _prepare_layer(params["w4"])
    return arrays, meta


# ---------------------------------------------------------------------------
# Discr forward (imagesize=32 branch)
# ---------------------------------------------------------------------------
def _conv_block(x_nhwc, lay_arr, lay_meta, *, stride, pad, bn, act, tile_target,
                out_dtype):
    N = x_nhwc.shape[0]
    kh, kw, cout = lay_meta["kh"], lay_meta["kw"], lay_meta["cout"]
    p, oh, ow = im2col(x_nhwc, kh, kw, stride, pad)
    m_real = p.shape[0]
    tile_m = _pick_tile_m(m_real, tile_target)
    m_pad = _round_up(m_real, tile_m)
    if m_pad != m_real:
        p = jnp.pad(p, ((0, m_pad - m_real), (0, 0)))
    p = p.astype(jnp.bfloat16)

    if bn:
        y, psum, psq = conv_stats(p, lay_arr["w"], tile_m=tile_m)
        y = bn_act(y, psum, psq, lay_arr["g"], lay_arr["b"],
                   tile_m=tile_m, m_real=m_real, out_dtype=out_dtype)
    else:
        y = conv_act(p, lay_arr["w"], tile_m=tile_m, act=act, out_dtype=out_dtype)

    y = y[:m_real, :cout]
    return y.reshape(N, oh, ow, cout)


def make_discr_forward(meta):
    """Close over static per-layer metadata; jit only sees array pytrees."""
    def discr_forward(x_nchw, arrays):
        x = jnp.transpose(x_nchw, (0, 2, 3, 1)).astype(jnp.bfloat16)  # NCHW -> NHWC
        # Conv(nc->ndf, 4, 2, 1) + LeakyReLU
        x = _conv_block(x, arrays["l1"], meta["l1"], stride=2, pad=1, bn=False,
                        act="leaky", tile_target=2048, out_dtype=jnp.bfloat16)
        # Conv(ndf->2ndf, 4, 2, 1) + BN + LeakyReLU
        x = _conv_block(x, arrays["l2"], meta["l2"], stride=2, pad=1, bn=True,
                        act="leaky", tile_target=1024, out_dtype=jnp.bfloat16)
        # Conv(2ndf->4ndf, 4, 2, 1) + BN + LeakyReLU
        x = _conv_block(x, arrays["l3"], meta["l3"], stride=2, pad=1, bn=True,
                        act="leaky", tile_target=1024, out_dtype=jnp.bfloat16)
        # Conv(4ndf->no, 4, 1, 0) + Sigmoid  (4x4 -> 1x1)
        x = _conv_block(x, arrays["l4"], meta["l4"], stride=1, pad=0, bn=False,
                        act="sigmoid", tile_target=512, out_dtype=jnp.float32)
        return jnp.transpose(x, (0, 3, 1, 2))          # NHWC -> NCHW, (N, no, 1, 1)
    return discr_forward


if __name__ == "__main__":
    # imagesize must be 32 for this branch; shrink ndf to keep the demo tiny.
    nc, ndf, no = 3, 16, 1
    batch = 2

    key = jax.random.PRNGKey(0)
    k_x, k_p = jax.random.split(key)
    x = jax.random.normal(k_x, (batch, nc, 32, 32), jnp.float32)  # NCHW like PyTorch
    params = init_discr_params(k_p, nc=nc, ndf=ndf, no=no)
    arrays, meta = prepare_discr_params(params)   # hoisted reshape/pad/bf16 cast

    fwd = jax.jit(make_discr_forward(meta))
    out = jax.block_until_ready(fwd(x, arrays))
    assert out.shape == (batch, no, 1, 1), out.shape
    assert bool(jnp.all(jnp.isfinite(out)))
    assert bool(jnp.all((out >= 0.0) & (out <= 1.0)))
    print("KERNEL_OK")
</pallas_src>

<mosaic_0001>
module attributes {stable_mosaic.version = 11 : i64} {
  func.func @_conv_act_kernel(%arg0: i32, %arg1: memref<512x48xbf16, #tpu.memory_space<vmem>>, %arg2: memref<48x128xbf16, #tpu.memory_space<vmem>>, %arg3: memref<512x128xbf16, #tpu.memory_space<vmem>>) attributes {dimension_semantics = [#tpu.dimension_semantics<parallel>], iteration_bounds = array<i64: 1>, scalar_prefetch = 0 : i64, scratch_operands = 0 : i64, tpu.core_type = #tpu.core_type<tc>, window_params = [{transform_indices = @transform_0, window_bounds = array<i64: 512, 48>}, {pipeline_mode = #tpu.pipeline_mode<synchronous>, transform_indices = @transform_1, window_bounds = array<i64: 48, 128>}, {transform_indices = @transform_2, window_bounds = array<i64: 512, 128>}]} {
    %c0 = arith.constant 0 : index
    %c0_0 = arith.constant 0 : index
    %0 = vector.load %arg1[%c0, %c0_0] : memref<512x48xbf16, #tpu.memory_space<vmem>>, vector<512x48xbf16>
    %c0_1 = arith.constant 0 : index
    %c0_2 = arith.constant 0 : index
    %1 = vector.load %arg2[%c0_1, %c0_2] : memref<48x128xbf16, #tpu.memory_space<vmem>>, vector<48x128xbf16>
    %cst = arith.constant dense<0.000000e+00> : vector<512x128xf32>
    %2 = tpu.matmul %0, %1, %cst {dimension_numbers = #tpu.dot_dimension_numbers<[1], [0], [0], [1], [0, 0, 1, 1], [], []>} : vector<512x48xbf16>, vector<48x128xbf16>, vector<512x128xf32> -> vector<512x128xf32>
    %cst_3 = arith.constant 0.000000e+00 : f32
    %3 = vector.broadcast %cst_3 : f32 to vector<512x128xf32>
    %4 = arith.cmpf ogt, %2, %3 : vector<512x128xf32>
    %cst_4 = arith.constant 2.000000e-01 : f32
    %5 = vector.broadcast %cst_4 : f32 to vector<512x128xf32>
    %6 = arith.mulf %5, %2 : vector<512x128xf32>
    %7 = arith.select %4, %2, %6 : vector<512x128xi1>, vector<512x128xf32>
    %8 = arith.truncf %7 : vector<512x128xf32> to vector<512x128xbf16>
    %c0_5 = arith.constant 0 : index
    %c0_6 = arith.constant 0 : index
    %9 = vector.load %arg3[%c0_5, %c0_6] : memref<512x128xbf16, #tpu.memory_space<vmem>>, vector<512x128xbf16>
    tpu.vector_store %arg3[%c0_5, %c0_6], %8 {strides = array<i32>} : memref<512x128xbf16, #tpu.memory_space<vmem>>, vector<512x128xbf16>,
    return
  }
  func.func @transform_0(%arg0: i32) -> (i32, i32) {
    %c0_i32 = arith.constant 0 : i32
    %c0_i32_0 = arith.constant 0 : i32
    return %arg0, %c0_i32 : i32, i32
  }
  func.func @transform_1(%arg0: i32) -> (i32, i32) {
    %c0_i32 = arith.constant 0 : i32
    %c0_i32_0 = arith.constant 0 : i32
    %c0_i32_1 = arith.constant 0 : i32
    return %c0_i32, %c0_i32_0 : i32, i32
  }
  func.func @transform_2(%arg0: i32) -> (i32, i32) {
    %c0_i32 = arith.constant 0 : i32
    %c0_i32_0 = arith.constant 0 : i32
    return %arg0, %c0_i32 : i32, i32
  }
}

module attributes {stable_mosaic.version = 11 : i64} {
  func.func @_conv_stats_kernel(%arg0: i32, %arg1: memref<128x256xbf16, #tpu.memory_space<vmem>>, %arg2: memref<256x128xbf16, #tpu.memory_space<vmem>>, %arg3: memref<128x128xbf16, #tpu.memory_space<vmem>>, %arg4: memref<8x128xf32, #tpu.memory_space<vmem>>, %arg5: memref<8x128xf32, #tpu.memory_space<vmem>>) attributes {dimension_semantics = [#tpu.dimension_semantics<parallel>], iteration_bounds = array<i64: 1>, scalar_prefetch = 0 : i64, scratch_operands = 0 : i64, tpu.core_type = #tpu.core_type<tc>, window_params = [{transform_indices = @transform_0, window_bounds = array<i64: 128, 256>}, {pipeline_mode = #tpu.pipeline_mode<synchronous>, transform_indices = @transform_1, window_bounds = array<i64: 256, 128>}, {transform_indices = @transform_2, window_bounds = array<i64: 128, 128>}, {transform_indices = @transform_3, window_bounds = array<i64: 8, 128>}, {transform_indices = @transform_4, window_bounds = array<i64: 8, 128>}]} {
    %c0 = arith.constant 0 : index
    %c0_0 = arith.constant 0 : index
    %0 = vector.load %arg1[%c0, %c0_0] : memref<128x256xbf16, #tpu.memory_space<vmem>>, vector<128x256xbf16>
    %c0_1 = arith.constant 0 : index
    %c0_2 = arith.constant 0 : index
    %1 = vector.load %arg2[%c0_1, %c0_2] : memref<256x128xbf16, #tpu.memory_space<vmem>>, vector<256x128xbf16>
    %cst = arith.constant dense<0.000000e+00> : vector<128x128xf32>
    %2 = tpu.matmul %0, %1, %cst {dimension_numbers = #tpu.dot_dimension_numbers<[1], [0], [0], [1], [0, 0, 1, 1], [], []>} : vector<128x256xbf16>, vector<256x128xbf16>, vector<128x128xf32> -> vector<128x128xf32>
    %3 = arith.truncf %2 : vector<128x128xf32> to vector<128x128xbf16>
    %c0_3 = arith.constant 0 : index
    %c0_4 = arith.constant 0 : index
    %4 = vector.load %arg3[%c0_3, %c0_4] : memref<128x128xbf16, #tpu.memory_space<vmem>>, vector<128x128xbf16>
    tpu.vector_store %arg3[%c0_3, %c0_4], %3 {strides = array<i32>} : memref<128x128xbf16, #tpu.memory_space<vmem>>, vector<128x128xbf16>,
    %cst_5 = arith.constant dense<0.000000e+00> : vector<128xf32>
    %5 = vector.multi_reduction <add>, %2, %cst_5 [0] : vector<128x128xf32> to vector<128xf32>
    %6 = vector.shape_cast %5 : vector<128xf32> to vector<1x128xf32>
    %cst_6 = arith.constant 1.250000e-01 : f32
    %7 = vector.broadcast %cst_6 : f32 to vector<1x128xf32>
    %8 = arith.mulf %6, %7 : vector<1x128xf32>
    %9 = arith.mulf %2, %2 : vector<128x128xf32>
    %cst_7 = arith.constant dense<0.000000e+00> : vector<128xf32>
    %10 = vector.multi_reduction <add>, %9, %cst_7 [0] : vector<128x128xf32> to vector<128xf32>
    %11 = vector.shape_cast %10 : vector<128xf32> to vector<1x128xf32>
    %cst_8 = arith.constant 1.250000e-01 : f32
    %12 = vector.broadcast %cst_8 : f32 to vector<1x128xf32>
    %13 = arith.mulf %11, %12 : vector<1x128xf32>
    %14 = vector.shape_cast %8 : vector<1x128xf32> to vector<1x128xf32>
    %15 = vector.broadcast %14 : vector<1x128xf32> to vector<8x128xf32>
    %c0_9 = arith.constant 0 : index
    %c0_10 = arith.constant 0 : index
    %16 = vector.load %arg4[%c0_9, %c0_10] : memref<8x128xf32, #tpu.memory_space<vmem>>, vector<8x128xf32>
    tpu.vector_store %arg4[%c0_9, %c0_10], %15 {strides = array<i32>} : memref<8x128xf32, #tpu.memory_space<vmem>>, vector<8x128xf32>,
    %17 = vector.shape_cast %13 : vector<1x128xf32> to vector<1x128xf32>
    %18 = vector.broadcast %17 : vector<1x128xf32> to vector<8x128xf32>
    %c0_11 = arith.constant 0 : index
    %c0_12 = arith.constant 0 : index
    %19 = vector.load %arg5[%c0_11, %c0_12] : memref<8x128xf32, #tpu.memory_space<vmem>>, vector<8x128xf32>
    tpu.vector_store %arg5[%c0_11, %c0_12], %18 {strides = array<i32>} : memref<8x128xf32, #tpu.memory_space<vmem>>, vector<8x128xf32>,
    return
  }
  func.func @transform_0(%arg0: i32) -> (i32, i32) {
    %c0_i32 = arith.constant 0 : i32
    %c0_i32_0 = arith.constant 0 : i32
    return %arg0, %c0_i32 : i32, i32
  }
  func.func @transform_1(%arg0: i32) -> (i32, i32) {
    %c0_i32 = arith.constant 0 : i32
    %c0_i32_0 = arith.constant 0 : i32
    %c0_i32_1 = arith.constant 0 : i32
    return %c0_i32, %c0_i32_0 : i32, i32
  }
  func.func @transform_2(%arg0: i32) -> (i32, i32) {
    %c0_i32 = arith.constant 0 : i32
    %c0_i32_0 = arith.constant 0 : i32
    return %arg0, %c0_i32 : i32, i32
  }
  func.func @transform_3(%arg0: i32) -> (i32, i32) {
    %c0_i32 = arith.constant 0 : i32
    %c0_i32_0 = arith.constant 0 : i32
    return %arg0, %c0_i32 : i32, i32
  }
  func.func @transform_4(%arg0: i32) -> (i32, i32) {
    %c0_i32 = arith.constant 0 : i32
    %c0_i32_0 = arith.constant 0 : i32
    return %arg0, %c0_i32 : i32, i32
  }
}

module attributes {stable_mosaic.version = 11 : i64} {
  func.func @_bn_act_kernel(%arg0: i32, %arg1: memref<128x128xbf16, #tpu.memory_space<vmem>>, %arg2: memref<8x128xf32, #tpu.memory_space<vmem>>, %arg3: memref<8x128xf32, #tpu.memory_space<vmem>>, %arg4: memref<1x128xf32, #tpu.memory_space<vmem>>, %arg5: memref<1x128xf32, #tpu.memory_space<vmem>>, %arg6: memref<128x128xbf16, #tpu.memory_space<vmem>>) attributes {dimension_semantics = [#tpu.dimension_semantics<parallel>], iteration_bounds = array<i64: 1>, scalar_prefetch = 0 : i64, scratch_operands = 0 : i64, tpu.core_type = #tpu.core_type<tc>, window_params = [{transform_indices = @transform_0, window_bounds = array<i64: 128, 128>}, {pipeline_mode = #tpu.pipeline_mode<synchronous>, transform_indices = @transform_1, window_bounds = array<i64: 8, 128>}, {pipeline_mode = #tpu.pipeline_mode<synchronous>, transform_indices = @transform_2, window_bounds = array<i64: 8, 128>}, {pipeline_mode = #tpu.pipeline_mode<synchronous>, transform_indices = @transform_3, window_bounds = array<i64: 1, 128>}, {pipeline_mode = #tpu.pipeline_mode<synchronous>, transform_indices = @transform_4, window_bounds = array<i64: 1, 128>}, {transform_indices = @transform_5, window_bounds = array<i64: 128, 128>}]} {
    %c0 = arith.constant 0 : index
    %c0_0 = arith.constant 0 : index
    %0 = vector.load %arg2[%c0, %c0_0] : memref<8x128xf32, #tpu.memory_space<vmem>>, vector<8x128xf32>
    %cst = arith.constant dense<0.000000e+00> : vector<128xf32>
    %1 = vector.multi_reduction <add>, %0, %cst [0] : vector<8x128xf32> to vector<128xf32>
    %2 = vector.shape_cast %1 : vector<128xf32> to vector<1x128xf32>
    %cst_1 = arith.constant 7.812500e-03 : f32
    %3 = vector.broadcast %cst_1 : f32 to vector<1x128xf32>
    %4 = arith.mulf %2, %3 : vector<1x128xf32>
    %c0_2 = arith.constant 0 : index
    %c0_3 = arith.constant 0 : index
    %5 = vector.load %arg3[%c0_2, %c0_3] : memref<8x128xf32, #tpu.memory_space<vmem>>, vector<8x128xf32>
    %cst_4 = arith.constant dense<0.000000e+00> : vector<128xf32>
    %6 = vector.multi_reduction <add>, %5, %cst_4 [0] : vector<8x128xf32> to vector<128xf32>
    %7 = vector.shape_cast %6 : vector<128xf32> to vector<1x128xf32>
    %cst_5 = arith.constant 7.812500e-03 : f32
    %8 = vector.broadcast %cst_5 : f32 to vector<1x128xf32>
    %9 = arith.mulf %7, %8 : vector<1x128xf32>
    %10 = arith.mulf %4, %4 : vector<1x128xf32>
    %11 = arith.subf %9, %10 : vector<1x128xf32>
    %cst_6 = arith.constant 0.000000e+00 : f32
    %12 = vector.broadcast %cst_6 : f32 to vector<1x128xf32>
    %13 = arith.maximumf %11, %12 : vector<1x128xf32>
    %cst_7 = arith.constant 9.99999974E-6 : f32
    %14 = vector.broadcast %cst_7 : f32 to vector<1x128xf32>
    %15 = arith.addf %13, %14 : vector<1x128xf32>
    %16 = math.rsqrt %15 : vector<1x128xf32>
    %c0_8 = arith.constant 0 : index
    %c0_9 = arith.constant 0 : index
    %17 = vector.load %arg4[%c0_8, %c0_9] : memref<1x128xf32, #tpu.memory_space<vmem>>, vector<1x128xf32>
    %18 = arith.mulf %16, %17 : vector<1x128xf32>
    %c0_10 = arith.constant 0 : index
    %c0_11 = arith.constant 0 : index
    %19 = vector.load %arg5[%c0_10, %c0_11] : memref<1x128xf32, #tpu.memory_space<vmem>>, vector<1x128xf32>
    %20 = arith.mulf %4, %18 : vector<1x128xf32>
    %21 = arith.subf %19, %20 : vector<1x128xf32>
    %c0_12 = arith.constant 0 : index
    %c0_13 = arith.constant 0 : index
    %22 = vector.load %arg1[%c0_12, %c0_13] : memref<128x128xbf16, #tpu.memory_space<vmem>>, vector<128x128xbf16>
    %23 = arith.extf %22 : vector<128x128xbf16> to vector<128x128xf32>
    %24 = vector.broadcast %18 : vector<1x128xf32> to vector<128x128xf32>
    %25 = arith.mulf %23, %24 : vector<128x128xf32>
    %26 = vector.broadcast %21 : vector<1x128xf32> to vector<128x128xf32>
    %27 = arith.addf %25, %26 : vector<128x128xf32>
    %cst_14 = arith.constant 0.000000e+00 : f32
    %28 = vector.broadcast %cst_14 : f32 to vector<128x128xf32>
    %29 = arith.cmpf ogt, %27, %28 : vector<128x128xf32>
    %cst_15 = arith.constant 2.000000e-01 : f32
    %30 = vector.broadcast %cst_15 : f32 to vector<128x128xf32>
    %31 = arith.mulf %30, %27 : vector<128x128xf32>
    %32 = arith.select %29, %27, %31 : vector<128x128xi1>, vector<128x128xf32>
    %33 = arith.truncf %32 : vector<128x128xf32> to vector<128x128xbf16>
    %c0_16 = arith.constant 0 : index
    %c0_17 = arith.constant 0 : index
    %34 = vector.load %arg6[%c0_16, %c0_17] : memref<128x128xbf16, #tpu.memory_space<vmem>>, vector<128x128xbf16>
    tpu.vector_store %arg6[%c0_16, %c0_17], %33 {strides = array<i32>} : memref<128x128xbf16, #tpu.memory_space<vmem>>, vector<128x128xbf16>,
    return
  }
  func.func @transform_0(%arg0: i32) -> (i32, i32) {
    %c0_i32 = arith.constant 0 : i32
    %c0_i32_0 = arith.constant 0 : i32
    return %arg0, %c0_i32 : i32, i32
  }
  func.func @transform_1(%arg0: i32) -> (i32, i32) {
    %c0_i32 = arith.constant 0 : i32
    %c0_i32_0 = arith.constant 0 : i32
    %c0_i32_1 = arith.constant 0 : i32
    return %c0_i32, %c0_i32_0 : i32, i32
  }
  func.func @transform_2(%arg0: i32) -> (i32, i32) {
    %c0_i32 = arith.constant 0 : i32
    %c0_i32_0 = arith.constant 0 : i32
    %c0_i32_1 = arith.constant 0 : i32
    return %c0_i32, %c0_i32_0 : i32, i32
  }
  func.func @transform_3(%arg0: i32) -> (i32, i32) {
    %c0_i32 = arith.constant 0 : i32
    %c0_i32_0 = arith.constant 0 : i32
    %c0_i32_1 = arith.constant 0 : i32
    return %c0_i32, %c0_i32_0 : i32, i32
  }
  func.func @transform_4(%arg0: i32) -> (i32, i32) {
    %c0_i32 = arith.constant 0 : i32
    %c0_i32_0 = arith.constant 0 : i32
    %c0_i32_1 = arith.constant 0 : i32
    return %c0_i32, %c0_i32_0 : i32, i32
  }
  func.func @transform_5(%arg0: i32) -> (i32, i32) {
    %c0_i32 = arith.constant 0 : i32
    %c0_i32_0 = arith.constant 0 : i32
    return %arg0, %c0_i32 : i32, i32
  }
}

module attributes {stable_mosaic.version = 11 : i64} {
  func.func @_bn_act_kernel(%arg0: i32, %arg1: memref<32x128xbf16, #tpu.memory_space<vmem>>, %arg2: memref<8x128xf32, #tpu.memory_space<vmem>>, %arg3: memref<8x128xf32, #tpu.memory_space<vmem>>, %arg4: memref<1x128xf32, #tpu.memory_space<vmem>>, %arg5: memref<1x128xf32, #tpu.memory_space<vmem>>, %arg6: memref<32x128xbf16, #tpu.memory_space<vmem>>) attributes {dimension_semantics = [#tpu.dimension_semantics<parallel>], iteration_bounds = array<i64: 1>, scalar_prefetch = 0 : i64, scratch_operands = 0 : i64, tpu.core_type = #tpu.core_type<tc>, window_params = [{transform_indices = @transform_0, window_bounds = array<i64: 32, 128>}, {pipeline_mode = #tpu.pipeline_mode<synchronous>, transform_indices = @transform_1, window_bounds = array<i64: 8, 128>}, {pipeline_mode = #tpu.pipeline_mode<synchronous>, transform_indices = @transform_2, window_bounds = array<i64: 8, 128>}, {pipeline_mode = #tpu.pipeline_mode<synchronous>, transform_indices = @transform_3, window_bounds = array<i64: 1, 128>}, {pipeline_mode = #tpu.pipeline_mode<synchronous>, transform_indices = @transform_4, window_bounds = array<i64: 1, 128>}, {transform_indices = @transform_5, window_bounds = array<i64: 32, 128>}]} {
    %c0 = arith.constant 0 : index
    %c0_0 = arith.constant 0 : index
    %0 = vector.load %arg2[%c0, %c0_0] : memref<8x128xf32, #tpu.memory_space<vmem>>, vector<8x128xf32>
    %cst = arith.constant dense<0.000000e+00> : vector<128xf32>
    %1 = vector.multi_reduction <add>, %0, %cst [0] : vector<8x128xf32> to vector<128xf32>
    %2 = vector.shape_cast %1 : vector<128xf32> to vector<1x128xf32>
    %cst_1 = arith.constant 3.125000e-02 : f32
    %3 = vector.broadcast %cst_1 : f32 to vector<1x128xf32>
    %4 = arith.mulf %2, %3 : vector<1x128xf32>
    %c0_2 = arith.constant 0 : index
    %c0_3 = arith.constant 0 : index
    %5 = vector.load %arg3[%c0_2, %c0_3] : memref<8x128xf32, #tpu.memory_space<vmem>>, vector<8x128xf32>
    %cst_4 = arith.constant dense<0.000000e+00> : vector<128xf32>
    %6 = vector.multi_reduction <add>, %5, %cst_4 [0] : vector<8x128xf32> to vector<128xf32>
    %7 = vector.shape_cast %6 : vector<128xf32> to vector<1x128xf32>
    %cst_5 = arith.constant 3.125000e-02 : f32
    %8 = vector.broadcast %cst_5 : f32 to vector<1x128xf32>
    %9 = arith.mulf %7, %8 : vector<1x128xf32>
    %10 = arith.mulf %4, %4 : vector<1x128xf32>
    %11 = arith.subf %9, %10 : vector<1x128xf32>
    %cst_6 = arith.constant 0.000000e+00 : f32
    %12 = vector.broadcast %cst_6 : f32 to vector<1x128xf32>
    %13 = arith.maximumf %11, %12 : vector<1x128xf32>
    %cst_7 = arith.constant 9.99999974E-6 : f32
    %14 = vector.broadcast %cst_7 : f32 to vector<1x128xf32>
    %15 = arith.addf %13, %14 : vector<1x128xf32>
    %16 = math.rsqrt %15 : vector<1x128xf32>
    %c0_8 = arith.constant 0 : index
    %c0_9 = arith.constant 0 : index
    %17 = vector.load %arg4[%c0_8, %c0_9] : memref<1x128xf32, #tpu.memory_space<vmem>>, vector<1x128xf32>
    %18 = arith.mulf %16, %17 : vector<1x128xf32>
    %c0_10 = arith.constant 0 : index
    %c0_11 = arith.constant 0 : index
    %19 = vector.load %arg5[%c0_10, %c0_11] : memref<1x128xf32, #tpu.memory_space<vmem>>, vector<1x128xf32>
    %20 = arith.mulf %4, %18 : vector<1x128xf32>
    %21 = arith.subf %19, %20 : vector<1x128xf32>
    %c0_12 = arith.constant 0 : index
    %c0_13 = arith.constant 0 : index
    %22 = vector.load %arg1[%c0_12, %c0_13] : memref<32x128xbf16, #tpu.memory_space<vmem>>, vector<32x128xbf16>
    %23 = arith.extf %22 : vector<32x128xbf16> to vector<32x128xf32>
    %24 = vector.broadcast %18 : vector<1x128xf32> to vector<32x128xf32>
    %25 = arith.mulf %23, %24 : vector<32x128xf32>
    %26 = vector.broadcast %21 : vector<1x128xf32> to vector<32x128xf32>
    %27 = arith.addf %25, %26 : vector<32x128xf32>
    %cst_14 = arith.constant 0.000000e+00 : f32
    %28 = vector.broadcast %cst_14 : f32 to vector<32x128xf32>
    %29 = arith.cmpf ogt, %27, %28 : vector<32x128xf32>
    %cst_15 = arith.constant 2.000000e-01 : f32
    %30 = vector.broadcast %cst_15 : f32 to vector<32x128xf32>
    %31 = arith.mulf %30, %27 : vector<32x128xf32>
    %32 = arith.select %29, %27, %31 : vector<32x128xi1>, vector<32x128xf32>
    %33 = arith.truncf %32 : vector<32x128xf32> to vector<32x128xbf16>
    %c0_16 = arith.constant 0 : index
    %c0_17 = arith.constant 0 : index
    %34 = vector.load %arg6[%c0_16, %c0_17] : memref<32x128xbf16, #tpu.memory_space<vmem>>, vector<32x128xbf16>
    tpu.vector_store %arg6[%c0_16, %c0_17], %33 {strides = array<i32>} : memref<32x128xbf16, #tpu.memory_space<vmem>>, vector<32x128xbf16>,
    return
  }
  func.func @transform_0(%arg0: i32) -> (i32, i32) {
    %c0_i32 = arith.constant 0 : i32
    %c0_i32_0 = arith.constant 0 : i32
    return %arg0, %c0_i32 : i32, i32
  }
  func.func @transform_1(%arg0: i32) -> (i32, i32) {
    %c0_i32 = arith.constant 0 : i32
    %c0_i32_0 = arith.constant 0 : i32
    %c0_i32_1 = arith.constant 0 : i32
    return %c0_i32, %c0_i32_0 : i32, i32
  }
  func.func @transform_2(%arg0: i32) -> (i32, i32) {
    %c0_i32 = arith.constant 0 : i32
    %c0_i32_0 = arith.constant 0 : i32
    %c0_i32_1 = arith.constant 0 : i32
    return %c0_i32, %c0_i32_0 : i32, i32
  }
  func.func @transform_3(%arg0: i32) -> (i32, i32) {
    %c0_i32 = arith.constant 0 : i32
    %c0_i32_0 = arith.constant 0 : i32
    %c0_i32_1 = arith.constant 0 : i32
    return %c0_i32, %c0_i32_0 : i32, i32
  }
  func.func @transform_4(%arg0: i32) -> (i32, i32) {
    %c0_i32 = arith.constant 0 : i32
    %c0_i32_0 = arith.constant 0 : i32
    %c0_i32_1 = arith.constant 0 : i32
    return %c0_i32, %c0_i32_0 : i32, i32
  }
  func.func @transform_5(%arg0: i32) -> (i32, i32) {
    %c0_i32 = arith.constant 0 : i32
    %c0_i32_0 = arith.constant 0 : i32
    return %arg0, %c0_i32 : i32, i32
  }
}

module attributes {stable_mosaic.version = 11 : i64} {
  func.func @_conv_stats_kernel(%arg0: i32, %arg1: memref<32x512xbf16, #tpu.memory_space<vmem>>, %arg2: memref<512x128xbf16, #tpu.memory_space<vmem>>, %arg3: memref<32x128xbf16, #tpu.memory_space<vmem>>, %arg4: memref<8x128xf32, #tpu.memory_space<vmem>>, %arg5: memref<8x128xf32, #tpu.memory_space<vmem>>) attributes {dimension_semantics = [#tpu.dimension_semantics<parallel>], iteration_bounds = array<i64: 1>, scalar_prefetch = 0 : i64, scratch_operands = 0 : i64, tpu.core_type = #tpu.core_type<tc>, window_params = [{transform_indices = @transform_0, window_bounds = array<i64: 32, 512>}, {pipeline_mode = #tpu.pipeline_mode<synchronous>, transform_indices = @transform_1, window_bounds = array<i64: 512, 128>}, {transform_indices = @transform_2, window_bounds = array<i64: 32, 128>}, {transform_indices = @transform_3, window_bounds = array<i64: 8, 128>}, {transform_indices = @transform_4, window_bounds = array<i64: 8, 128>}]} {
    %c0 = arith.constant 0 : index
    %c0_0 = arith.constant 0 : index
    %0 = vector.load %arg1[%c0, %c0_0] : memref<32x512xbf16, #tpu.memory_space<vmem>>, vector<32x512xbf16>
    %c0_1 = arith.constant 0 : index
    %c0_2 = arith.constant 0 : index
    %1 = vector.load %arg2[%c0_1, %c0_2] : memref<512x128xbf16, #tpu.memory_space<vmem>>, vector<512x128xbf16>
    %cst = arith.constant dense<0.000000e+00> : vector<32x128xf32>
    %2 = tpu.matmul %0, %1, %cst {dimension_numbers = #tpu.dot_dimension_numbers<[1], [0], [0], [1], [0, 0, 1, 1], [], []>} : vector<32x512xbf16>, vector<512x128xbf16>, vector<32x128xf32> -> vector<32x128xf32>
    %3 = arith.truncf %2 : vector<32x128xf32> to vector<32x128xbf16>
    %c0_3 = arith.constant 0 : index
    %c0_4 = arith.constant 0 : index
    %4 = vector.load %arg3[%c0_3, %c0_4] : memref<32x128xbf16, #tpu.memory_space<vmem>>, vector<32x128xbf16>
    tpu.vector_store %arg3[%c0_3, %c0_4], %3 {strides = array<i32>} : memref<32x128xbf16, #tpu.memory_space<vmem>>, vector<32x128xbf16>,
    %cst_5 = arith.constant dense<0.000000e+00> : vector<128xf32>
    %5 = vector.multi_reduction <add>, %2, %cst_5 [0] : vector<32x128xf32> to vector<128xf32>
    %6 = vector.shape_cast %5 : vector<128xf32> to vector<1x128xf32>
    %cst_6 = arith.constant 1.250000e-01 : f32
    %7 = vector.broadcast %cst_6 : f32 to vector<1x128xf32>
    %8 = arith.mulf %6, %7 : vector<1x128xf32>
    %9 = arith.mulf %2, %2 : vector<32x128xf32>
    %cst_7 = arith.constant dense<0.000000e+00> : vector<128xf32>
    %10 = vector.multi_reduction <add>, %9, %cst_7 [0] : vector<32x128xf32> to vector<128xf32>
    %11 = vector.shape_cast %10 : vector<128xf32> to vector<1x128xf32>
    %cst_8 = arith.constant 1.250000e-01 : f32
    %12 = vector.broadcast %cst_8 : f32 to vector<1x128xf32>
    %13 = arith.mulf %11, %12 : vector<1x128xf32>
    %14 = vector.shape_cast %8 : vector<1x128xf32> to vector<1x128xf32>
    %15 = vector.broadcast %14 : vector<1x128xf32> to vector<8x128xf32>
    %c0_9 = arith.constant 0 : index
    %c0_10 = arith.constant 0 : index
    %16 = vector.load %arg4[%c0_9, %c0_10] : memref<8x128xf32, #tpu.memory_space<vmem>>, vector<8x128xf32>
    tpu.vector_store %arg4[%c0_9, %c0_10], %15 {strides = array<i32>} : memref<8x128xf32, #tpu.memory_space<vmem>>, vector<8x128xf32>,
    %17 = vector.shape_cast %13 : vector<1x128xf32> to vector<1x128xf32>
    %18 = vector.broadcast %17 : vector<1x128xf32> to vector<8x128xf32>
    %c0_11 = arith.constant 0 : index
    %c0_12 = arith.constant 0 : index
    %19 = vector.load %arg5[%c0_11, %c0_12] : memref<8x128xf32, #tpu.memory_space<vmem>>, vector<8x128xf32>
    tpu.vector_store %arg5[%c0_11, %c0_12], %18 {strides = array<i32>} : memref<8x128xf32, #tpu.memory_space<vmem>>, vector<8x128xf32>,
    return
  }
  func.func @transform_0(%arg0: i32) -> (i32, i32) {
    %c0_i32 = arith.constant 0 : i32
    %c0_i32_0 = arith.constant 0 : i32
    return %arg0, %c0_i32 : i32, i32
  }
  func.func @transform_1(%arg0: i32) -> (i32, i32) {
    %c0_i32 = arith.constant 0 : i32
    %c0_i32_0 = arith.constant 0 : i32
    %c0_i32_1 = arith.constant 0 : i32
    return %c0_i32, %c0_i32_0 : i32, i32
  }
  func.func @transform_2(%arg0: i32) -> (i32, i32) {
    %c0_i32 = arith.constant 0 : i32
    %c0_i32_0 = arith.constant 0 : i32
    return %arg0, %c0_i32 : i32, i32
  }
  func.func @transform_3(%arg0: i32) -> (i32, i32) {
    %c0_i32 = arith.constant 0 : i32
    %c0_i32_0 = arith.constant 0 : i32
    return %arg0, %c0_i32 : i32, i32
  }
  func.func @transform_4(%arg0: i32) -> (i32, i32) {
    %c0_i32 = arith.constant 0 : i32
    %c0_i32_0 = arith.constant 0 : i32
    return %arg0, %c0_i32 : i32, i32
  }
}

module attributes {stable_mosaic.version = 11 : i64} {
  func.func @_conv_act_kernel(%arg0: i32, %arg1: memref<16x1024xbf16, #tpu.memory_space<vmem>>, %arg2: memref<1024x128xbf16, #tpu.memory_space<vmem>>, %arg3: memref<16x128xf32, #tpu.memory_space<vmem>>) attributes {dimension_semantics = [#tpu.dimension_semantics<parallel>], iteration_bounds = array<i64: 1>, scalar_prefetch = 0 : i64, scratch_operands = 0 : i64, tpu.core_type = #tpu.core_type<tc>, window_params = [{transform_indices = @transform_0, window_bounds = array<i64: 16, 1024>}, {pipeline_mode = #tpu.pipeline_mode<synchronous>, transform_indices = @transform_1, window_bounds = array<i64: 1024, 128>}, {transform_indices = @transform_2, window_bounds = array<i64: 16, 128>}]} {
    %c0 = arith.constant 0 : index
    %c0_0 = arith.constant 0 : index
    %0 = vector.load %arg1[%c0, %c0_0] : memref<16x1024xbf16, #tpu.memory_space<vmem>>, vector<16x1024xbf16>
    %c0_1 = arith.constant 0 : index
    %c0_2 = arith.constant 0 : index
    %1 = vector.load %arg2[%c0_1, %c0_2] : memref<1024x128xbf16, #tpu.memory_space<vmem>>, vector<1024x128xbf16>
    %cst = arith.constant dense<0.000000e+00> : vector<16x128xf32>
    %2 = tpu.matmul %0, %1, %cst {dimension_numbers = #tpu.dot_dimension_numbers<[1], [0], [0], [1], [0, 0, 1, 1], [], []>} : vector<16x1024xbf16>, vector<1024x128xbf16>, vector<16x128xf32> -> vector<16x128xf32>
    %cst_3 = arith.constant 0.000000e+00 : f32
    %3 = vector.broadcast %cst_3 : f32 to vector<16x128xf32>
    %4 = arith.subf %3, %2 : vector<16x128xf32>
    %5 = math.exp %4 : vector<16x128xf32>
    %cst_4 = arith.constant 1.000000e+00 : f32
    %6 = vector.broadcast %cst_4 : f32 to vector<16x128xf32>
    %7 = arith.addf %6, %5 : vector<16x128xf32>
    %cst_5 = arith.constant 1.000000e+00 : f32
    %8 = vector.broadcast %cst_5 : f32 to vector<16x128xf32>
    %9 = arith.divf %8, %7 : vector<16x128xf32>
    %c0_6 = arith.constant 0 : index
    %c0_7 = arith.constant 0 : index
    %10 = vector.load %arg3[%c0_6, %c0_7] : memref<16x128xf32, #tpu.memory_space<vmem>>, vector<16x128xf32>
    tpu.vector_store %arg3[%c0_6, %c0_7], %9 {strides = array<i32>} : memref<16x128xf32, #tpu.memory_space<vmem>>, vector<16x128xf32>,
    return
  }
  func.func @transform_0(%arg0: i32) -> (i32, i32) {
    %c0_i32 = arith.constant 0 : i32
    %c0_i32_0 = arith.constant 0 : i32
    return %arg0, %c0_i32 : i32, i32
  }
  func.func @transform_1(%arg0: i32) -> (i32, i32) {
    %c0_i32 = arith.constant 0 : i32
    %c0_i32_0 = arith.constant 0 : i32
    %c0_i32_1 = arith.constant 0 : i32
    return %c0_i32, %c0_i32_0 : i32, i32
  }
  func.func @transform_2(%arg0: i32) -> (i32, i32) {
    %c0_i32 = arith.constant 0 : i32
    %c0_i32_0 = arith.constant 0 : i32
    return %arg0, %c0_i32 : i32, i32
  }
}

</mosaic_0001>

<bundles_post_ra>
// kernel: discr_forward.6
= control target key start
LH: loop header
LB: loop body
LE: loop exit
PB: predicated region body
PF: predicated region fallthrough
CT: control target
= control target key end

     0   :  { %vm260_vm0 = vcmask 392192   ;;  %s1505_s1 = inlined_call_operand.vmem [shape: bf16[48,128], index: 1, kind: input, shape index: {}]   ;;  %s1506_s0 = inlined_call_operand.vmem [shape: bf16[512,48], index: 0, kind: input, shape index: {}]   ;;  %s1507_s2 = inlined_call_operand.vmem [shape: bf16[512,128], index: 2, kind: output, shape index: {}]  }
   0x1   :  { %v1056_v0 = vld [vmem:[%s1505_s1 + $0x10] sm:$0xff]  ;;  %v1055_v1 = vld [vmem:[%s1505_s1 + $0x8] sm:$0xff]  ;;  %v1054_v2 = vld [vmem:[%s1505_s1] sm:$0xff] }
   0x2   :  { %362 = vmatpush.bf16.msra.mxu0 %v1056_v0  ;;  %1248 = vmatpush.bf16.msra.mxu1 %v1056_v0  ;;  %v1022_v3 = vld [vmem:[%s1506_s0] sm:$0xff]  ;;  %v1023_v7 = vld [vmem:[%s1506_s0 + $0x8] sm:$0xff]  ;;  %v1024_v11 = vld [vmem:[%s1506_s0 + $0x10] sm:$0xff] }
   0x3   :  { %1249 = vmatpush.bf16.msra.mxu2 %v1056_v0  ;;  %1250 = vmatpush.bf16.msra.mxu3 %v1056_v0  ;;  %v1030_v4 = vld [vmem:[%s1506_s0 + $0x40] sm:$0xff]  ;;  %v1031_v8 = vld [vmem:[%s1506_s0 + $0x48] sm:$0xff]  ;;  %v1032_v12 = vld [vmem:[%s1506_s0 + $0x50] sm:$0xff] }
   0x4   :  { %v1038_v5 = vld [vmem:[%s1506_s0 + $0x80] sm:$0xff]  ;;  %v1039_v9 = vld [vmem:[%s1506_s0 + $0x88] sm:$0xff]  ;;  %v1040_v13 = vld [vmem:[%s1506_s0 + $0x90] sm:$0xff] }
   0x5   :  { %v1046_v6 = vld [vmem:[%s1506_s0 + $0xc0] sm:$0xff]  ;;  %v1047_v10 = vld [vmem:[%s1506_s0 + $0xc8] sm:$0xff]  ;;  %v1048_v14 = vld [vmem:[%s1506_s0 + $0xd0] sm:$0xff] }
   0x6   :  { %363 = vmatpush.bf16.msra.mxu0 %v1055_v1  ;;  %1251 = vmatpush.bf16.msra.mxu1 %v1055_v1  ;;  %v1025_v15 = vld [vmem:[%s1506_s0 + $0x18] sm:$0xff]  ;;  %v1026_v19 = vld [vmem:[%s1506_s0 + $0x20] sm:$0xff]  ;;  %v1027_v23 = vld [vmem:[%s1506_s0 + $0x28] sm:$0xff] }
   0x7   :  { %1252 = vmatpush.bf16.msra.mxu2 %v1055_v1  ;;  %1253 = vmatpush.bf16.msra.mxu3 %v1055_v1  ;;  %v1033_v16 = vld [vmem:[%s1506_s0 + $0x58] sm:$0xff]  ;;  %v1034_v20 = vld [vmem:[%s1506_s0 + $0x60] sm:$0xff]  ;;  %v1035_v24 = vld [vmem:[%s1506_s0 + $0x68] sm:$0xff] }
   0x8   :  { %v1041_v17 = vld [vmem:[%s1506_s0 + $0x98] sm:$0xff]  ;;  %v1042_v21 = vld [vmem:[%s1506_s0 + $0xa0] sm:$0xff]  ;;  %v1043_v25 = vld [vmem:[%s1506_s0 + $0xa8] sm:$0xff] }
   0x9   :  { %v1049_v18 = vld [vmem:[%s1506_s0 + $0xd8] sm:$0xff]  ;;  %v1050_v22 = vld [vmem:[%s1506_s0 + $0xe0] sm:$0xff]  ;;  %v1051_v26 = vld [vmem:[%s1506_s0 + $0xe8] sm:$0xff] }
   0xa   :  { %364 = vmatpush.bf16.msra.mxu0 %v1054_v2  ;;  %1254 = vmatpush.bf16.msra.mxu1 %v1054_v2  ;;  %v1028_v27 = vld [vmem:[%s1506_s0 + $0x30] sm:$0xff]  ;;  %v1029_v31 = vld [vmem:[%s1506_s0 + $0x38] sm:$0xff] }
   0xb   :  { %1255 = vmatpush.bf16.msra.mxu2 %v1054_v2  ;;  %1256 = vmatpush.bf16.msra.mxu3 %v1054_v2  ;;  %v1036_v28 = vld [vmem:[%s1506_s0 + $0x70] sm:$0xff]  ;;  %v1037_v32 = vld [vmem:[%s1506_s0 + $0x78] sm:$0xff] }
   0xc   :  { %v1044_v29 = vld [vmem:[%s1506_s0 + $0xb0] sm:$0xff]  ;;  %v1045_v33 = vld [vmem:[%s1506_s0 + $0xb8] sm:$0xff] }
   0xd   :  { %990 = vmatmul.msk.bf16.vlgmr.msra.gmra.mxu0 %vm260_vm0, %v1022_v3  ;;  %998 = vmatmul.msk.bf16.vlgmr.msra.gmra.mxu1 %vm260_vm0, %v1030_v4  ;;  %v1052_v30 = vld [vmem:[%s1506_s0 + $0xf0] sm:$0xff]  ;;  %v1053_v34 = vld [vmem:[%s1506_s0 + $0xf8] sm:$0xff] }
   0xe   :  { %1006 = vmatmul.msk.bf16.vlgmr.msra.gmra.mxu2 %vm260_vm0, %v1038_v5  ;;  %1014 = vmatmul.msk.bf16.vlgmr.msra.gmra.mxu3 %vm260_vm0, %v1046_v6 }
  0x1d   :  { %991 = vmatmul.msk.bf16.gmra.mxu0 %vm260_vm0, %v1023_v7  ;;  %999 = vmatmul.msk.bf16.gmra.mxu1 %vm260_vm0, %v1031_v8 }
  0x1e   :  { %1007 = vmatmul.msk.bf16.gmra.mxu2 %vm260_vm0, %v1039_v9  ;;  %1015 = vmatmul.msk.bf16.gmra.mxu3 %vm260_vm0, %v1047_v10 }
  0x2d   :  { %992 = vmatmul.msk.bf16.gmra.mxu0 %vm260_vm0, %v1024_v11  ;;  %1000 = vmatmul.msk.bf16.gmra.mxu1 %vm260_vm0, %v1032_v12 }
  0x2e   :  { %1008 = vmatmul.msk.bf16.gmra.mxu2 %vm260_vm0, %v1040_v13  ;;  %1016 = vmatmul.msk.bf16.gmra.mxu3 %vm260_vm0, %v1048_v14 }
  0x3d   :  { %993 = vmatmul.msk.bf16.gmra.mxu0 %vm260_vm0, %v1025_v15  ;;  %1001 = vmatmul.msk.bf16.gmra.mxu1 %vm260_vm0, %v1033_v16 }
  0x3e   :  { %1009 = vmatmul.msk.bf16.gmra.mxu2 %vm260_vm0, %v1041_v17  ;;  %1017 = vmatmul.msk.bf16.gmra.mxu3 %vm260_vm0, %v1049_v18 }
  0x4d   :  { %994 = vmatmul.msk.bf16.gmra.mxu0 %vm260_vm0, %v1026_v19  ;;  %1002 = vmatmul.msk.bf16.gmra.mxu1 %vm260_vm0, %v1034_v20 }
  0x4e   :  { %1010 = vmatmul.msk.bf16.gmra.mxu2 %vm260_vm0, %v1042_v21  ;;  %1018 = vmatmul.msk.bf16.gmra.mxu3 %vm260_vm0, %v1050_v22 }
  0x5d   :  { %995 = vmatmul.msk.bf16.gmra.mxu0 %vm260_vm0, %v1027_v23  ;;  %1003 = vmatmul.msk.bf16.gmra.mxu1 %vm260_vm0, %v1035_v24 }
  0x5e   :  { %1011 = vmatmul.msk.bf16.gmra.mxu2 %vm260_vm0, %v1043_v25  ;;  %1019 = vmatmul.msk.bf16.gmra.mxu3 %vm260_vm0, %v1051_v26 }
  0x6d   :  { %996 = vmatmul.msk.bf16.gmra.mxu0 %vm260_vm0, %v1028_v27  ;;  %1004 = vmatmul.msk.bf16.gmra.mxu1 %vm260_vm0, %v1036_v28 }
  0x6e   :  { %1012 = vmatmul.msk.bf16.gmra.mxu2 %vm260_vm0, %v1044_v29  ;;  %1020 = vmatmul.msk.bf16.gmra.mxu3 %vm260_vm0, %v1052_v30 }
  0x7d   :  { %997 = vmatmul.msk.bf16.gmra.mxu0 %vm260_vm0, %v1029_v31  ;;  %1005 = vmatmul.msk.bf16.gmra.mxu1 %vm260_vm0, %v1037_v32 }
  0x7e   :  { %1013 = vmatmul.msk.bf16.gmra.mxu2 %vm260_vm0, %v1045_v33  ;;  %1021 = vmatmul.msk.bf16.gmra.mxu3 %vm260_vm0, %v1053_v34 }
  0x8a   :  { %v366_v35 = vpop.f32.mrf.mxu0  ;;  %v406_v36 = vpop.f32.mrf.mxu1 }
  0x8b   :  { %v590_v37 = vmul.f32 0.2, %v366_v35  ;;  %v606_v38 = vmul.f32 0.2, %v406_v36  ;;  %vm526_vm1 = vcmp.gt.f32.partialorder %v366_v35, 0.0  ;;  %vm542_vm2 = vcmp.gt.f32.partialorder %v406_v36, 0.0 }
  0x8d   :  { %v654_v45 = vsel %vm526_vm1, %v366_v35, %v590_v37  ;;  %v670_v46 = vsel %vm542_vm2, %v406_v36, %v606_v38 }
  0x91   :  { %v446_v39 = vpop.f32.mrf.mxu2  ;;  %v486_v40 = vpop.f32.mrf.mxu3 }
  0x92   :  { %v368_v41 = vpop.f32.mrf.mxu0  ;;  %v408_v42 = vpop.f32.mrf.mxu1  ;;  %v622_v51 = vmul.f32 0.2, %v446_v39  ;;  %v638_v52 = vmul.f32 0.2, %v486_v40  ;;  %vm558_vm5 = vcmp.gt.f32.partialorder %v446_v39, 0.0  ;;  %vm574_vm6 = vcmp.gt.f32.partialorder %v486_v40, 0.0 }
  0x93   :  { %vm527_vm3 = vcmp.gt.f32.partialorder %v368_v41, 0.0  ;;  %v591_v43 = vmul.f32 0.2, %v368_v41  ;;  %vm543_vm4 = vcmp.gt.f32.partialorder %v408_v42, 0.0  ;;  %v607_v44 = vmul.f32 0.2, %v408_v42 }
  0x94   :  { %v686_v59 = vsel %vm558_vm5, %v446_v39, %v622_v51  ;;  %v702_v60 = vsel %vm574_vm6, %v486_v40, %v638_v52 }
  0x95   :  { %v655_v47 = vsel %vm527_vm3, %v368_v41, %v591_v43  ;;  %v671_v48 = vsel %vm543_vm4, %v408_v42, %v607_v44 }
  0x96   :  { %v1060_v49 = vpack.c.bf16 %v655_v47, %v654_v45  ;;  %v1100_v50 = vpack.c.bf16 %v671_v48, %v670_v46 }
  0x98   :  { %1061 = vst [vmem:[%s1507_s2] sm:$0xff] %v1060_v49  }
  0x99   :  { %1224 = vst [vmem:[%s1507_s2 + $0x40] sm:$0xff] %v1100_v50   ;;  %v448_v53 = vpop.f32.mrf.mxu2  ;;  %v488_v54 = vpop.f32.mrf.mxu3 }
  0x9a   :  { %vm559_vm7 = vcmp.gt.f32.partialorder %v448_v53, 0.0  ;;  %v623_v55 = vmul.f32 0.2, %v448_v53  ;;  %vm575_vm8 = vcmp.gt.f32.partialorder %v488_v54, 0.0  ;;  %v639_v56 = vmul.f32 0.2, %v488_v54  ;;  %v371_v57 = vpop.f32.mrf.mxu0  ;;  %v411_v58 = vpop.f32.mrf.mxu1 }
  0x9b   :  { %v592_v1 = vmul.f32 0.2, %v371_v57  ;;  %v608_v2 = vmul.f32 0.2, %v411_v58  ;;  %vm528_vm9 = vcmp.gt.f32.partialorder %v371_v57, 0.0  ;;  %vm544_vm10 = vcmp.gt.f32.partialorder %v411_v58, 0.0 }
  0x9c   :  { %v687_v61 = vsel %vm559_vm7, %v448_v53, %v623_v55  ;;  %v703_v62 = vsel %vm575_vm8, %v488_v54, %v639_v56 }
  0x9d   :  { %v1140_v63 = vpack.c.bf16 %v687_v61, %v686_v59  ;;  %v1180_v0 = vpack.c.bf16 %v703_v62, %v702_v60  ;;  %v656_v9 = vsel %vm528_vm9, %v371_v57, %v592_v1  ;;  %v672_v10 = vsel %vm544_vm10, %v411_v58, %v608_v2 }
  0x9f   :  { %1232 = vst [vmem:[%s1507_s2 + $0x80] sm:$0xff] %v1140_v63  }
  0xa0   :  { %1240 = vst [vmem:[%s1507_s2 + $0xc0] sm:$0xff] %v1180_v0  }
  0xa1   :  { %v451_v3 = vpop.f32.mrf.mxu2  ;;  %v491_v4 = vpop.f32.mrf.mxu3 }
  0xa2   :  { %v373_v5 = vpop.f32.mrf.mxu0  ;;  %v413_v6 = vpop.f32.mrf.mxu1  ;;  %v624_v15 = vmul.f32 0.2, %v451_v3  ;;  %v640_v16 = vmul.f32 0.2, %v491_v4  ;;  %vm560_vm13 = vcmp.gt.f32.partialorder %v451_v3, 0.0  ;;  %vm576_vm14 = vcmp.gt.f32.partialorder %v491_v4, 0.0 }
  0xa3   :  { %vm529_vm11 = vcmp.gt.f32.partialorder %v373_v5, 0.0  ;;  %v593_v7 = vmul.f32 0.2, %v373_v5  ;;  %vm545_vm12 = vcmp.gt.f32.partialorder %v413_v6, 0.0  ;;  %v609_v8 = vmul.f32 0.2, %v413_v6 }
  0xa4   :  { %v688_v23 = vsel %vm560_vm13, %v451_v3, %v624_v15  ;;  %v704_v24 = vsel %vm576_vm14, %v491_v4, %v640_v16 }
  0xa5   :  { %v657_v11 = vsel %vm529_vm11, %v373_v5, %v593_v7  ;;  %v673_v12 = vsel %vm545_vm12, %v413_v6, %v609_v8 }
  0xa6   :  { %v1065_v13 = vpack.c.bf16 %v657_v11, %v656_v9  ;;  %v1105_v14 = vpack.c.bf16 %v673_v12, %v672_v10 }
  0xa8   :  { %1217 = vst [vmem:[%s1507_s2 + $0x8] sm:$0xff] %v1065_v13  }
  0xa9   :  { %1225 = vst [vmem:[%s1507_s2 + $0x48] sm:$0xff] %v1105_v14   ;;  %v453_v17 = vpop.f32.mrf.mxu2  ;;  %v493_v18 = vpop.f32.mrf.mxu3 }
  0xaa   :  { %vm561_vm15 = vcmp.gt.f32.partialorder %v453_v17, 0.0  ;;  %v625_v19 = vmul.f32 0.2, %v453_v17  ;;  %vm577_vm0 = vcmp.gt.f32.partialorder %v493_v18, 0.0  ;;  %v641_v20 = vmul.f32 0.2, %v493_v18  ;;  %v376_v21 = vpop.f32.mrf.mxu0  ;;  %v416_v22 = vpop.f32.mrf.mxu1 }
  0xab   :  { %v594_v29 = vmul.f32 0.2, %v376_v21  ;;  %v610_v30 = vmul.f32 0.2, %v416_v22  ;;  %vm530_vm1 = vcmp.gt.f32.partialorder %v376_v21, 0.0  ;;  %vm546_vm2 = vcmp.gt.f32.partialorder %v416_v22, 0.0 }
  0xac   :  { %v689_v25 = vsel %vm561_vm15, %v453_v17, %v625_v19  ;;  %v705_v26 = vsel %vm577_vm0, %v493_v18, %v641_v20 }
  0xad   :  { %v1145_v27 = vpack.c.bf16 %v689_v25, %v688_v23  ;;  %v1185_v28 = vpack.c.bf16 %v705_v26, %v704_v24  ;;  %v658_v37 = vsel %vm530_vm1, %v376_v21, %v594_v29  ;;  %v674_v38 = vsel %vm546_vm2, %v416_v22, %v610_v30 }
  0xaf   :  { %1233 = vst [vmem:[%s1507_s2 + $0x88] sm:$0xff] %v1145_v27  }
  0xb0   :  { %1241 = vst [vmem:[%s1507_s2 + $0xc8] sm:$0xff] %v1185_v28  }
  0xb1   :  { %v456_v31 = vpop.f32.mrf.mxu2  ;;  %v496_v32 = vpop.f32.mrf.mxu3 }
  0xb2   :  { %v378_v33 = vpop.f32.mrf.mxu0  ;;  %v418_v34 = vpop.f32.mrf.mxu1  ;;  %v626_v43 = vmul.f32 0.2, %v456_v31  ;;  %v642_v44 = vmul.f32 0.2, %v496_v32  ;;  %vm562_vm5 = vcmp.gt.f32.partialorder %v456_v31, 0.0  ;;  %vm578_vm6 = vcmp.gt.f32.partialorder %v496_v32, 0.0 }
  0xb3   :  { %vm531_vm3 = vcmp.gt.f32.partialorder %v378_v33, 0.0  ;;  %v595_v35 = vmul.f32 0.2, %v378_v33  ;;  %vm547_vm4 = vcmp.gt.f32.partialorder %v418_v34, 0.0  ;;  %v611_v36 = vmul.f32 0.2, %v418_v34 }
  0xb4   :  { %v690_v51 = vsel %vm562_vm5, %v456_v31, %v626_v43  ;;  %v706_v52 = vsel %vm578_vm6, %v496_v32, %v642_v44 }
  0xb5   :  { %v659_v39 = vsel %vm531_vm3, %v378_v33, %v595_v35  ;;  %v675_v40 = vsel %vm547_vm4, %v418_v34, %v611_v36 }
  0xb6   :  { %v1070_v41 = vpack.c.bf16 %v659_v39, %v658_v37  ;;  %v1110_v42 = vpack.c.bf16 %v675_v40, %v674_v38 }
  0xb8   :  { %1218 = vst [vmem:[%s1507_s2 + $0x10] sm:$0xff] %v1070_v41  }
  0xb9   :  { %1226 = vst [vmem:[%s1507_s2 + $0x50] sm:$0xff] %v1110_v42   ;;  %v458_v45 = vpop.f32.mrf.mxu2  ;;  %v498_v46 = vpop.f32.mrf.mxu3 }
  0xba   :  { %vm563_vm7 = vcmp.gt.f32.partialorder %v458_v45, 0.0  ;;  %v627_v47 = vmul.f32 0.2, %v458_v45  ;;  %vm579_vm8 = vcmp.gt.f32.partialorder %v498_v46, 0.0  ;;  %v643_v48 = vmul.f32 0.2, %v498_v46  ;;  %v381_v49 = vpop.f32.mrf.mxu0  ;;  %v421_v50 = vpop.f32.mrf.mxu1 }
  0xbb   :  { %v596_v57 = vmul.f32 0.2, %v381_v49  ;;  %v612_v58 = vmul.f32 0.2, %v421_v50  ;;  %vm532_vm9 = vcmp.gt.f32.partialorder %v381_v49, 0.0  ;;  %vm548_vm10 = vcmp.gt.f32.partialorder %v421_v50, 0.0 }
  0xbc   :  { %v691_v53 = vsel %vm563_vm7, %v458_v45, %v627_v47  ;;  %v707_v54 = vsel %vm579_vm8, %v498_v46, %v643_v48 }
  0xbd   :  { %v1150_v55 = vpack.c.bf16 %v691_v53, %v690_v51  ;;  %v1190_v56 = vpack.c.bf16 %v707_v54, %v706_v52  ;;  %v660_v1 = vsel %vm532_vm9, %v381_v49, %v596_v57  ;;  %v676_v2 = vsel %vm548_vm10, %v421_v50, %v612_v58 }
  0xbf   :  { %1234 = vst [vmem:[%s1507_s2 + $0x90] sm:$0xff] %v1150_v55  }
  0xc0   :  { %1242 = vst [vmem:[%s1507_s2 + $0xd0] sm:$0xff] %v1190_v56  }
  0xc1   :  { %v461_v59 = vpop.f32.mrf.mxu2  ;;  %v501_v60 = vpop.f32.mrf.mxu3 }
  0xc2   :  { %v383_v61 = vpop.f32.mrf.mxu0  ;;  %v423_v62 = vpop.f32.mrf.mxu1  ;;  %v628_v7 = vmul.f32 0.2, %v461_v59  ;;  %v644_v8 = vmul.f32 0.2, %v501_v60  ;;  %vm564_vm13 = vcmp.gt.f32.partialorder %v461_v59, 0.0  ;;  %vm580_vm14 = vcmp.gt.f32.partialorder %v501_v60, 0.0 }
  0xc3   :  { %vm533_vm11 = vcmp.gt.f32.partialorder %v383_v61, 0.0  ;;  %v597_v63 = vmul.f32 0.2, %v383_v61  ;;  %vm549_vm12 = vcmp.gt.f32.partialorder %v423_v62, 0.0  ;;  %v613_v0 = vmul.f32 0.2, %v423_v62 }
  0xc4   :  { %v692_v15 = vsel %vm564_vm13, %v461_v59, %v628_v7  ;;  %v708_v16 = vsel %vm580_vm14, %v501_v60, %v644_v8 }
  0xc5   :  { %v661_v3 = vsel %vm533_vm11, %v383_v61, %v597_v63  ;;  %v677_v4 = vsel %vm549_vm12, %v423_v62, %v613_v0 }
  0xc6   :  { %v1075_v5 = vpack.c.bf16 %v661_v3, %v660_v1  ;;  %v1115_v6 = vpack.c.bf16 %v677_v4, %v676_v2 }
  0xc8   :  { %1219 = vst [vmem:[%s1507_s2 + $0x18] sm:$0xff] %v1075_v5  }
  0xc9   :  { %1227 = vst [vmem:[%s1507_s2 + $0x58] sm:$0xff] %v1115_v6   ;;  %v463_v9 = vpop.f32.mrf.mxu2  ;;  %v503_v10 = vpop.f32.mrf.mxu3 }
  0xca   :  { %vm565_vm15 = vcmp.gt.f32.partialorder %v463_v9, 0.0  ;;  %v629_v11 = vmul.f32 0.2, %v463_v9  ;;  %vm581_vm0 = vcmp.gt.f32.partialorder %v503_v10, 0.0  ;;  %v645_v12 = vmul.f32 0.2, %v503_v10  ;;  %v386_v13 = vpop.f32.mrf.mxu0  ;;  %v426_v14 = vpop.f32.mrf.mxu1 }
  0xcb   :  { %v598_v21 = vmul.f32 0.2, %v386_v13  ;;  %v614_v22 = vmul.f32 0.2, %v426_v14  ;;  %vm534_vm1 = vcmp.gt.f32.partialorder %v386_v13, 0.0  ;;  %vm550_vm2 = vcmp.gt.f32.partialorder %v426_v14, 0.0 }
  0xcc   :  { %v693_v17 = vsel %vm565_vm15, %v463_v9, %v629_v11  ;;  %v709_v18 = vsel %vm581_vm0, %v503_v10, %v645_v12 }
  0xcd   :  { %v1155_v19 = vpack.c.bf16 %v693_v17, %v692_v15  ;;  %v1195_v20 = vpack.c.bf16 %v709_v18, %v708_v16  ;;  %v662_v29 = vsel %vm534_vm1, %v386_v13, %v598_v21  ;;  %v678_v30 = vsel %vm550_vm2, %v426_v14, %v614_v22 }
  0xcf   :  { %1235 = vst [vmem:[%s1507_s2 + $0x98] sm:$0xff] %v1155_v19  }
  0xd0   :  { %1243 = vst [vmem:[%s1507_s2 + $0xd8] sm:$0xff] %v1195_v20  }
  0xd1   :  { %v466_v23 = vpop.f32.mrf.mxu2  ;;  %v506_v24 = vpop.f32.mrf.mxu3 }
  0xd2   :  { %v388_v25 = vpop.f32.mrf.mxu0  ;;  %v428_v26 = vpop.f32.mrf.mxu1  ;;  %v630_v35 = vmul.f32 0.2, %v466_v23  ;;  %v646_v36 = vmul.f32 0.2, %v506_v24  ;;  %vm566_vm5 = vcmp.gt.f32.partialorder %v466_v23, 0.0  ;;  %vm582_vm6 = vcmp.gt.f32.partialorder %v506_v24, 0.0 }
  0xd3   :  { %vm535_vm3 = vcmp.gt.f32.partialorder %v388_v25, 0.0  ;;  %v599_v27 = vmul.f32 0.2, %v388_v25  ;;  %vm551_vm4 = vcmp.gt.f32.partialorder %v428_v26, 0.0  ;;  %v615_v28 = vmul.f32 0.2, %v428_v26 }
  0xd4   :  { %v694_v43 = vsel %vm566_vm5, %v466_v23, %v630_v35  ;;  %v710_v44 = vsel %vm582_vm6, %v506_v24, %v646_v36 }
  0xd5   :  { %v663_v31 = vsel %vm535_vm3, %v388_v25, %v599_v27  ;;  %v679_v32 = vsel %vm551_vm4, %v428_v26, %v615_v28 }
  0xd6   :  { %v1080_v33 = vpack.c.bf16 %v663_v31, %v662_v29  ;;  %v1120_v34 = vpack.c.bf16 %v679_v32, %v678_v30 }
  0xd8   :  { %1220 = vst [vmem:[%s1507_s2 + $0x20] sm:$0xff] %v1080_v33  }
  0xd9   :  { %1228 = vst [vmem:[%s1507_s2 + $0x60] sm:$0xff] %v1120_v34   ;;  %v468_v37 = vpop.f32.mrf.mxu2  ;;  %v508_v38 = vpop.f32.mrf.mxu3 }
  0xda   :  { %vm567_vm7 = vcmp.gt.f32.partialorder %v468_v37, 0.0  ;;  %v631_v39 = vmul.f32 0.2, %v468_v37  ;;  %vm583_vm8 = vcmp.gt.f32.partialorder %v508_v38, 0.0  ;;  %v647_v40 = vmul.f32 0.2, %v508_v38  ;;  %v391_v41 = vpop.f32.mrf.mxu0  ;;  %v431_v42 = vpop.f32.mrf.mxu1 }
  0xdb   :  { %v600_v49 = vmul.f32 0.2, %v391_v41  ;;  %v616_v50 = vmul.f32 0.2, %v431_v42  ;;  %vm536_vm9 = vcmp.gt.f32.partialorder %v391_v41, 0.0  ;;  %vm552_vm10 = vcmp.gt.f32.partialorder %v431_v42, 0.0 }
  0xdc   :  { %v695_v45 = vsel %vm567_vm7, %v468_v37, %v631_v39  ;;  %v711_v46 = vsel %vm583_vm8, %v508_v38, %v647_v40 }
  0xdd   :  { %v1160_v47 = vpack.c.bf16 %v695_v45, %v694_v43  ;;  %v1200_v48 = vpack.c.bf16 %v711_v46, %v710_v44  ;;  %v664_v57 = vsel %vm536_vm9, %v391_v41, %v600_v49  ;;  %v680_v58 = vsel %vm552_vm10, %v431_v42, %v616_v50 }
  0xdf   :  { %1236 = vst [vmem:[%s1507_s2 + $0xa0] sm:$0xff] %v1160_v47  }
  0xe0   :  { %1244 = vst [vmem:[%s1507_s2 + $0xe0] sm:$0xff] %v1200_v48  }
  0xe1   :  { %v471_v51 = vpop.f32.mrf.mxu2  ;;  %v511_v52 = vpop.f32.mrf.mxu3 }
  0xe2   :  { %v393_v53 = vpop.f32.mrf.mxu0  ;;  %v433_v54 = vpop.f32.mrf.mxu1  ;;  %v632_v63 = vmul.f32 0.2, %v471_v51  ;;  %v648_v0 = vmul.f32 0.2, %v511_v52  ;;  %vm568_vm13 = vcmp.gt.f32.partialorder %v471_v51, 0.0  ;;  %vm584_vm14 = vcmp.gt.f32.partialorder %v511_v52, 0.0 }
  0xe3   :  { %vm537_vm11 = vcmp.gt.f32.partialorder %v393_v53, 0.0  ;;  %v601_v55 = vmul.f32 0.2, %v393_v53  ;;  %vm553_vm12 = vcmp.gt.f32.partialorder %v433_v54, 0.0  ;;  %v617_v56 = vmul.f32 0.2, %v433_v54 }
  0xe4   :  { %v696_v7 = vsel %vm568_vm13, %v471_v51, %v632_v63  ;;  %v712_v8 = vsel %vm584_vm14, %v511_v52, %v648_v0 }
  0xe5   :  { %v665_v59 = vsel %vm537_vm11, %v393_v53, %v601_v55  ;;  %v681_v60 = vsel %vm553_vm12, %v433_v54, %v617_v56 }
  0xe6   :  { %v1085_v61 = vpack.c.bf16 %v665_v59, %v664_v57  ;;  %v1125_v62 = vpack.c.bf16 %v681_v60, %v680_v58 }
  0xe8   :  { %1221 = vst [vmem:[%s1507_s2 + $0x28] sm:$0xff] %v1085_v61  }
  0xe9   :  { %1229 = vst [vmem:[%s1507_s2 + $0x68] sm:$0xff] %v1125_v62   ;;  %v473_v1 = vpop.f32.mrf.mxu2  ;;  %v513_v2 = vpop.f32.mrf.mxu3 }
  0xea   :  { %vm569_vm15 = vcmp.gt.f32.partialorder %v473_v1, 0.0  ;;  %v633_v3 = vmul.f32 0.2, %v473_v1  ;;  %vm585_vm0 = vcmp.gt.f32.partialorder %v513_v2, 0.0  ;;  %v649_v4 = vmul.f32 0.2, %v513_v2  ;;  %v396_v5 = vpop.f32.mrf.mxu0  ;;  %v436_v6 = vpop.f32.mrf.mxu1 }
  0xeb   :  { %v602_v13 = vmul.f32 0.2, %v396_v5  ;;  %v618_v14 = vmul.f32 0.2, %v436_v6  ;;  %vm538_vm1 = vcmp.gt.f32.partialorder %v396_v5, 0.0  ;;  %vm554_vm2 = vcmp.gt.f32.partialorder %v436_v6, 0.0 }
  0xec   :  { %v697_v9 = vsel %vm569_vm15, %v473_v1, %v633_v3  ;;  %v713_v10 = vsel %vm585_vm0, %v513_v2, %v649_v4 }
  0xed   :  { %v1165_v11 = vpack.c.bf16 %v697_v9, %v696_v7  ;;  %v1205_v12 = vpack.c.bf16 %v713_v10, %v712_v8  ;;  %v666_v21 = vsel %vm538_vm1, %v396_v5, %v602_v13  ;;  %v682_v22 = vsel %vm554_vm2, %v436_v6, %v618_v14 }
  0xef   :  { %1237 = vst [vmem:[%s1507_s2 + $0xa8] sm:$0xff] %v1165_v11  }
  0xf0   :  { %1245 = vst [vmem:[%s1507_s2 + $0xe8] sm:$0xff] %v1205_v12  }
  0xf1   :  { %v476_v15 = vpop.f32.mrf.mxu2  ;;  %v516_v16 = vpop.f32.mrf.mxu3 }
  0xf2   :  { %v398_v17 = vpop.f32.mrf.mxu0  ;;  %v438_v18 = vpop.f32.mrf.mxu1  ;;  %v634_v27 = vmul.f32 0.2, %v476_v15  ;;  %v650_v28 = vmul.f32 0.2, %v516_v16  ;;  %vm570_vm5 = vcmp.gt.f32.partialorder %v476_v15, 0.0  ;;  %vm586_vm6 = vcmp.gt.f32.partialorder %v516_v16, 0.0 }
  0xf3   :  { %vm539_vm3 = vcmp.gt.f32.partialorder %v398_v17, 0.0  ;;  %v603_v19 = vmul.f32 0.2, %v398_v17  ;;  %vm555_vm4 = vcmp.gt.f32.partialorder %v438_v18, 0.0  ;;  %v619_v20 = vmul.f32 0.2, %v438_v18 }
  0xf4   :  { %v698_v35 = vsel %vm570_vm5, %v476_v15, %v634_v27  ;;  %v714_v36 = vsel %vm586_vm6, %v516_v16, %v650_v28 }
  0xf5   :  { %v667_v23 = vsel %vm539_vm3, %v398_v17, %v603_v19  ;;  %v683_v24 = vsel %vm555_vm4, %v438_v18, %v619_v20 }
  0xf6   :  { %v1090_v25 = vpack.c.bf16 %v667_v23, %v666_v21  ;;  %v1130_v26 = vpack.c.bf16 %v683_v24, %v682_v22 }
  0xf8   :  { %1222 = vst [vmem:[%s1507_s2 + $0x30] sm:$0xff] %v1090_v25  }
  0xf9   :  { %1230 = vst [vmem:[%s1507_s2 + $0x70] sm:$0xff] %v1130_v26   ;;  %v478_v29 = vpop.f32.mrf.mxu2  ;;  %v518_v30 = vpop.f32.mrf.mxu3 }
  0xfa   :  { %vm571_vm7 = vcmp.gt.f32.partialorder %v478_v29, 0.0  ;;  %v635_v31 = vmul.f32 0.2, %v478_v29  ;;  %vm587_vm8 = vcmp.gt.f32.partialorder %v518_v30, 0.0  ;;  %v651_v32 = vmul.f32 0.2, %v518_v30  ;;  %v401_v33 = vpop.f32.mrf.mxu0  ;;  %v441_v34 = vpop.f32.mrf.mxu1 }
  0xfb   :  { %v604_v41 = vmul.f32 0.2, %v401_v33  ;;  %v620_v42 = vmul.f32 0.2, %v441_v34  ;;  %vm540_vm9 = vcmp.gt.f32.partialorder %v401_v33, 0.0  ;;  %vm556_vm10 = vcmp.gt.f32.partialorder %v441_v34, 0.0 }
  0xfc   :  { %v699_v37 = vsel %vm571_vm7, %v478_v29, %v635_v31  ;;  %v715_v38 = vsel %vm587_vm8, %v518_v30, %v651_v32 }
  0xfd   :  { %v1170_v39 = vpack.c.bf16 %v699_v37, %v698_v35  ;;  %v1210_v40 = vpack.c.bf16 %v715_v38, %v714_v36  ;;  %v668_v49 = vsel %vm540_vm9, %v401_v33, %v604_v41  ;;  %v684_v50 = vsel %vm556_vm10, %v441_v34, %v620_v42 }
  0xff   :  { %1238 = vst [vmem:[%s1507_s2 + $0xb0] sm:$0xff] %v1170_v39  }
 0x100   :  { %1246 = vst [vmem:[%s1507_s2 + $0xf0] sm:$0xff] %v1210_v40  }
 0x101   :  { %v481_v43 = vpop.f32.mrf.mxu2  ;;  %v521_v44 = vpop.f32.mrf.mxu3 }
 0x102   :  { %v403_v45 = vpop.f32.mrf.mxu0  ;;  %v443_v46 = vpop.f32.mrf.mxu1  ;;  %v636_v55 = vmul.f32 0.2, %v481_v43  ;;  %v652_v56 = vmul.f32 0.2, %v521_v44  ;;  %vm572_vm13 = vcmp.gt.f32.partialorder %v481_v43, 0.0  ;;  %vm588_vm14 = vcmp.gt.f32.partialorder %v521_v44, 0.0 }
 0x103   :  { %vm541_vm11 = vcmp.gt.f32.partialorder %v403_v45, 0.0  ;;  %v605_v47 = vmul.f32 0.2, %v403_v45  ;;  %vm557_vm12 = vcmp.gt.f32.partialorder %v443_v46, 0.0  ;;  %v621_v48 = vmul.f32 0.2, %v443_v46 }
 0x104   :  { %v700_v61 = vsel %vm572_vm13, %v481_v43, %v636_v55  ;;  %v716_v62 = vsel %vm588_vm14, %v521_v44, %v652_v56 }
 0x105   :  { %v669_v51 = vsel %vm541_vm11, %v403_v45, %v605_v47  ;;  %v685_v52 = vsel %vm557_vm12, %v443_v46, %v621_v48 }
 0x106   :  { %v1095_v53 = vpack.c.bf16 %v669_v51, %v668_v49  ;;  %v1135_v54 = vpack.c.bf16 %v685_v52, %v684_v50 }
 0x108   :  { %1223 = vst [vmem:[%s1507_s2 + $0x38] sm:$0xff] %v1095_v53  }
 0x109   :  { %1231 = vst [vmem:[%s1507_s2 + $0x78] sm:$0xff] %v1135_v54   ;;  %v483_v57 = vpop.f32.mrf.mxu2  ;;  %v523_v58 = vpop.f32.mrf.mxu3 }
 0x10a   :  { %vm573_vm15 = vcmp.gt.f32.partialorder %v483_v57, 0.0  ;;  %v637_v59 = vmul.f32 0.2, %v483_v57  ;;  %vm589_vm0 = vcmp.gt.f32.partialorder %v523_v58, 0.0  ;;  %v653_v60 = vmul.f32 0.2, %v523_v58 }
 0x10c   :  { %v701_v63 = vsel %vm573_vm15, %v483_v57, %v637_v59  ;;  %v717_v0 = vsel %vm589_vm0, %v523_v58, %v653_v60 }
 0x10d   :  { %v1175_v1 = vpack.c.bf16 %v701_v63, %v700_v61  ;;  %v1215_v2 = vpack.c.bf16 %v717_v0, %v716_v62 }
 0x10f   :  { %1239 = vst [vmem:[%s1507_s2 + $0xb8] sm:$0xff] %v1175_v1  }
 0x110   :  { %1247 = vst [vmem:[%s1507_s2 + $0xf8] sm:$0xff] %v1215_v2  }

// kernel: discr_forward.8
= control target key start
LH: loop header
LB: loop body
LE: loop exit
PB: predicated region body
PF: predicated region fallthrough
CT: control target
= control target key end

     0   :  { %s429_s1 = inlined_call_operand.vmem [shape: f32[8,128], index: 1, kind: input, shape index: {}]   ;;  %s430_s2 = inlined_call_operand.vmem [shape: f32[8,128], index: 2, kind: input, shape index: {}]   ;;  %s431_s0 = inlined_call_operand.vmem [shape: bf16[128,128], index: 0, kind: input, shape index: {}]   ;;  %s432_s3 = inlined_call_operand.vmem [shape: f32[1,128], index: 3, kind: input, shape index: {}]   ;;  %s433_s4 = inlined_call_operand.vmem [shape: f32[1,128], index: 4, kind: input, shape index: {}]   ;;  %s434_s5 = inlined_call_operand.vmem [shape: bf16[128,128], index: 5, kind: output, shape index: {}]  }
   0x1   :  { %v20_v0 = vld [vmem:[%s429_s1] sm:$0xff]  ;;  %v279_v26 = vld [vmem:[%s431_s0 + $0x8] sm:$0xff]   ;;  %v280_v29 = vld [vmem:[%s431_s0 + $0x10] sm:$0xff]  }
   0x2   :  { %v28_v1 = vld [vmem:[%s430_s2] sm:$0xff]  ;;  %v21_v2 = vrot.slane %v20_v0, 4  ;;  %v281_v30 = vld [vmem:[%s431_s0 + $0x18] sm:$0xff]   ;;  %v213_v35 = vunpack.c.l.bf16 %v279_v26  ;;  %v283_v36 = vld [vmem:[%s431_s0 + $0x28] sm:$0xff]   ;;  %v214_v38 = vunpack.c.h.bf16 %v279_v26  ;;  %v217_v39 = vunpack.c.l.bf16 %v280_v29 }
   0x3   :  { %v29_v3 = vrot.slane %v28_v1, 4  ;;  %v208_v25 = vld [vmem:[%s431_s0] sm:$0xff]   ;;  %v218_v40 = vunpack.c.h.bf16 %v280_v29  ;;  %v284_v41 = vld [vmem:[%s431_s0 + $0x30] sm:$0xff]   ;;  %v358_v42 = vld [vmem:[%s431_s0 + $0x38] sm:$0xff]   ;;  %v221_v44 = vunpack.c.l.bf16 %v281_v30  ;;  %v222_v45 = vunpack.c.h.bf16 %v281_v30 }
   0x4   :  { %v22_v4 = vadd.f32 %v21_v2, %v20_v0  ;;  %v50_v28 = vld [vmem:[%s432_s3] sm:$0x1]  ;;  %v209_v33 = vunpack.c.l.bf16 %v208_v25  ;;  %v210_v34 = vunpack.c.h.bf16 %v208_v25  ;;  %v229_v50 = vunpack.c.l.bf16 %v283_v36 }
   0x5   :  { %v30_v5 = vadd.f32 %v29_v3, %v28_v1  ;;  %v282_v31 = vld [vmem:[%s431_s0 + $0x20] sm:$0xff]   ;;  %v230_v51 = vunpack.c.h.bf16 %v283_v36  ;;  %v233_v52 = vunpack.c.l.bf16 %v284_v41  ;;  %v234_v53 = vunpack.c.h.bf16 %v284_v41 }
   0x6   :  { %v23_v6 = vrot.slane %v22_v4, 2  ;;  %v52_v43 = vld [vmem:[%s433_s4] sm:$0x1]  ;;  %v225_v46 = vunpack.c.l.bf16 %v282_v31  ;;  %v226_v47 = vunpack.c.h.bf16 %v282_v31  ;;  %v237_v54 = vunpack.c.l.bf16 %v358_v42 }
   0x7   :  { %v31_v7 = vrot.slane %v30_v5, 2  ;;  %v238_v55 = vunpack.c.h.bf16 %v358_v42 }
   0x8   :  { %v24_v8 = vadd.f32 %v23_v6, %v22_v4 }
   0x9   :  { %v32_v9 = vadd.f32 %v31_v7, %v30_v5 }
   0xa   :  { %v25_v10 = vrot.slane %v24_v8, 1 }
   0xb   :  { %v33_v11 = vrot.slane %v32_v9, 1 }
   0xc   :  { %v26_v12 = vadd.f32 %v25_v10, %v24_v8 }
   0xd   :  { %v34_v13 = vadd.f32 %v33_v11, %v32_v9 }
   0xe   :  { %v27_v14 = vmul.f32 0.0078125, %v26_v12 }
   0xf   :  { %v35_v15 = vmul.f32 0.0078125, %v34_v13 }
  0x10   :  { %v36_v16 = vmul.f32 %v27_v14, %v27_v14 }
  0x12   :  { %v37_v17 = vsub.f32 %v35_v15, %v36_v16 }
  0x14   :  { %v38_v18 = vmax.f32 %v37_v17, 0.0 }
  0x16   :  { %v39_v19 = vadd.f32 1e-05, %v38_v18 }
  0x18   :  { %293 = vrsqrt.f32 %v39_v19  ;;  %vm46_vm0 = vweird.f32 %v39_v19 }
  0x1e   :  { %v294_v20 = vpop.eup %293 }
  0x1f   :  { %v41_v21 = vmul.f32 %v294_v20, %v39_v19  ;;  %vm47_vm1 = vweird.f32 %v294_v20 }
  0x20   :  { %vm48_vm2 = vmor %vm46_vm0, %vm47_vm1 }
  0x21   :  { %v42_v22 = vmul.f32 %v294_v20, %v41_v21 }
  0x23   :  { %v43_v23 = vmul.f32 0.5, %v42_v22 }
  0x25   :  { %v44_v24 = vsub.f32 1.5, %v43_v23 }
  0x27   :  { %v45_v27 = vmul.f32 %v294_v20, %v44_v24 }
  0x29   :  { %v49_v32 = vsel %vm48_vm2, %v294_v20, %v45_v27 }
  0x2a   :  { %v51_v37 = vmul.f32 %v50_v28, %v49_v32 }
  0x2c   :  { %v53_v48 = vmul.f32 %v51_v37, %v27_v14  ;;  %v363_v49 = vperm.slane %v51_v37, 0 }
  0x2e   :  { %v54_v56 = vsub.f32 %v52_v43, %v53_v48  ;;  %v88_v57 = vmul.f32 %v209_v33, %v363_v49  ;;  %v89_v58 = vmul.f32 %v210_v34, %v363_v49  ;;  %v90_v59 = vmul.f32 %v213_v35, %v363_v49 }
  0x2f   :  { %v91_v60 = vmul.f32 %v214_v38, %v363_v49  ;;  %v92_v61 = vmul.f32 %v217_v39, %v363_v49  ;;  %v93_v62 = vmul.f32 %v218_v40, %v363_v49  ;;  %v94_v63 = vmul.f32 %v221_v44, %v363_v49 }
  0x30   :  { %v374_v0 = vperm.slane %v54_v56, 0  ;;  %v95_v1 = vmul.f32 %v222_v45, %v363_v49  ;;  %v96_v2 = vmul.f32 %v225_v46, %v363_v49  ;;  %v97_v3 = vmul.f32 %v226_v47, %v363_v49 }
  0x31   :  { %v98_v4 = vmul.f32 %v229_v50, %v363_v49  ;;  %v99_v5 = vmul.f32 %v230_v51, %v363_v49  ;;  %v100_v6 = vmul.f32 %v233_v52, %v363_v49  ;;  %v101_v7 = vmul.f32 %v234_v53, %v363_v49 }
  0x32   :  { %v107_v8 = vadd.f32 %v374_v0, %v88_v57  ;;  %v108_v9 = vadd.f32 %v374_v0, %v89_v58  ;;  %v109_v10 = vadd.f32 %v374_v0, %v90_v59  ;;  %v110_v11 = vadd.f32 %v374_v0, %v91_v60 }
  0x33   :  { %v111_v12 = vadd.f32 %v374_v0, %v92_v61  ;;  %v112_v13 = vadd.f32 %v374_v0, %v93_v62  ;;  %v113_v14 = vadd.f32 %v374_v0, %v94_v63  ;;  %v114_v15 = vadd.f32 %v374_v0, %v95_v1 }
  0x34   :  { %vm123_vm3 = vcmp.gt.f32.partialorder %v107_v8, 0.0  ;;  %vm124_vm4 = vcmp.gt.f32.partialorder %v108_v9, 0.0  ;;  %v139_v16 = vmul.f32 0.2, %v107_v8  ;;  %v140_v17 = vmul.f32 0.2, %v108_v9 }
  0x35   :  { %vm125_vm5 = vcmp.gt.f32.partialorder %v109_v10, 0.0  ;;  %vm126_vm6 = vcmp.gt.f32.partialorder %v110_v11, 0.0  ;;  %v141_v18 = vmul.f32 0.2, %v109_v10  ;;  %v142_v19 = vmul.f32 0.2, %v110_v11 }
  0x36   :  { %v155_v20 = vsel %vm123_vm3, %v107_v8, %v139_v16  ;;  %v156_v21 = vsel %vm124_vm4, %v108_v9, %v140_v17  ;;  %vm127_vm7 = vcmp.gt.f32.partialorder %v111_v12, 0.0  ;;  %vm128_vm8 = vcmp.gt.f32.partialorder %v112_v13, 0.0 }
  0x37   :  { %v242_v22 = vpack.c.bf16 %v156_v21, %v155_v20  ;;  %v157_v23 = vsel %vm125_vm5, %v109_v10, %v141_v18  ;;  %v158_v24 = vsel %vm126_vm6, %v110_v11, %v142_v19  ;;  %v143_v25 = vmul.f32 0.2, %v111_v12 }
  0x38   :  { %v247_v26 = vpack.c.bf16 %v158_v24, %v157_v23  ;;  %v144_v27 = vmul.f32 0.2, %v112_v13  ;;  %vm129_vm9 = vcmp.gt.f32.partialorder %v113_v14, 0.0  ;;  %vm130_vm10 = vcmp.gt.f32.partialorder %v114_v15, 0.0 }
  0x39   :  { %243 = vst [vmem:[%s434_s5] sm:$0xff] %v242_v22   ;;  %v159_v28 = vsel %vm127_vm7, %v111_v12, %v143_v25  ;;  %v145_v29 = vmul.f32 0.2, %v113_v14  ;;  %v146_v30 = vmul.f32 0.2, %v114_v15  ;;  %v115_v31 = vadd.f32 %v374_v0, %v96_v2 }
  0x3a   :  { %286 = vst [vmem:[%s434_s5 + $0x8] sm:$0xff] %v247_v26   ;;  %v160_v32 = vsel %vm128_vm8, %v112_v13, %v144_v27  ;;  %v116_v33 = vadd.f32 %v374_v0, %v97_v3  ;;  %v117_v34 = vadd.f32 %v374_v0, %v98_v4  ;;  %v118_v35 = vadd.f32 %v374_v0, %v99_v5 }
  0x3b   :  { %v252_v36 = vpack.c.bf16 %v160_v32, %v159_v28  ;;  %v161_v37 = vsel %vm129_vm9, %v113_v14, %v145_v29  ;;  %v162_v38 = vsel %vm130_vm10, %v114_v15, %v146_v30  ;;  %vm131_vm11 = vcmp.gt.f32.partialorder %v115_v31, 0.0 }
  0x3c   :  { %v257_v39 = vpack.c.bf16 %v162_v38, %v161_v37  ;;  %vm132_vm12 = vcmp.gt.f32.partialorder %v116_v33, 0.0  ;;  %v147_v40 = vmul.f32 0.2, %v115_v31  ;;  %v148_v41 = vmul.f32 0.2, %v116_v33 }
  0x3d   :  { %287 = vst [vmem:[%s434_s5 + $0x10] sm:$0xff] %v252_v36   ;;  %vm133_vm13 = vcmp.gt.f32.partialorder %v117_v34, 0.0  ;;  %vm134_vm14 = vcmp.gt.f32.partialorder %v118_v35, 0.0  ;;  %v149_v43 = vmul.f32 0.2, %v117_v34  ;;  %v119_v44 = vadd.f32 %v374_v0, %v100_v6 }
  0x3e   :  { %288 = vst [vmem:[%s434_s5 + $0x18] sm:$0xff] %v257_v39   ;;  %v163_v45 = vsel %vm131_vm11, %v115_v31, %v147_v40  ;;  %v164_v46 = vsel %vm132_vm12, %v116_v33, %v148_v41  ;;  %v150_v47 = vmul.f32 0.2, %v118_v35  ;;  %v120_v48 = vadd.f32 %v374_v0, %v101_v7 }
  0x3f   :  { %v262_v50 = vpack.c.bf16 %v164_v46, %v163_v45  ;;  %v165_v51 = vsel %vm133_vm13, %v117_v34, %v149_v43  ;;  %vm135_vm15 = vcmp.gt.f32.partialorder %v119_v44, 0.0  ;;  %v151_v52 = vmul.f32 0.2, %v119_v44 }
  0x40   :  { %v166_v53 = vsel %vm134_vm14, %v118_v35, %v150_v47  ;;  %vm136_vm0 = vcmp.gt.f32.partialorder %v120_v48, 0.0  ;;  %v152_v56 = vmul.f32 0.2, %v120_v48  ;;  %v102_v57 = vmul.f32 %v237_v54, %v363_v49 }
  0x41   :  { %289 = vst [vmem:[%s434_s5 + $0x20] sm:$0xff] %v262_v50   ;;  %v267_v58 = vpack.c.bf16 %v166_v53, %v165_v51  ;;  %v167_v59 = vsel %vm135_vm15, %v119_v44, %v151_v52  ;;  %v103_v60 = vmul.f32 %v238_v55, %v363_v49 }
  0x42   :  { %v168_v61 = vsel %vm136_vm0, %v120_v48, %v152_v56  ;;  %v121_v62 = vadd.f32 %v374_v0, %v102_v57 }
  0x43   :  { %290 = vst [vmem:[%s434_s5 + $0x28] sm:$0xff] %v267_v58   ;;  %v272_v63 = vpack.c.bf16 %v168_v61, %v167_v59  ;;  %v122_v54 = vadd.f32 %v374_v0, %v103_v60 }
  0x44   :  { %vm137_vm1 = vcmp.gt.f32.partialorder %v121_v62, 0.0  ;;  %v153_v1 = vmul.f32 0.2, %v121_v62 }
  0x45   :  { %291 = vst [vmem:[%s434_s5 + $0x30] sm:$0xff] %v272_v63   ;;  %vm138_vm2 = vcmp.gt.f32.partialorder %v122_v54, 0.0  ;;  %v154_v2 = vmul.f32 0.2, %v122_v54 }
  0x46   :  { %v169_v42 = vsel %vm137_vm1, %v121_v62, %v153_v1 }
  0x47   :  { %v170_v49 = vsel %vm138_vm2, %v122_v54, %v154_v2 }
  0x48   :  { %v277_v55 = vpack.c.bf16 %v170_v49, %v169_v42 }
  0x4a   :  { %292 = vst [vmem:[%s434_s5 + $0x38] sm:$0xff] %v277_v55  }

// kernel: discr_forward.7
= control target key start
LH: loop header
LB: loop body
LE: loop exit
PB: predicated region body
PF: predicated region fallthrough
CT: control target
= control target key end

     0   :  { %s888_s1 = inlined_call_operand.vmem [shape: bf16[256,128], index: 1, kind: input, shape index: {}]   ;;  %s889_s0 = inlined_call_operand.vmem [shape: bf16[128,256], index: 0, kind: input, shape index: {}]   ;;  %s890_s2 = inlined_call_operand.vmem [shape: bf16[128,128], index: 2, kind: output, shape index: {0}]   ;;  %s891_s3 = inlined_call_operand.vmem [shape: f32[8,128], index: 3, kind: output, shape index: {1}]   ;;  %s892_s4 = inlined_call_operand.vmem [shape: f32[8,128], index: 4, kind: output, shape index: {2}]  }
   0x1   :  { %v593_v0 = vld [vmem:[%s888_s1 + $0x38] sm:$0xff]  ;;  %v592_v2 = vld [vmem:[%s888_s1 + $0x30] sm:$0xff]  ;;  %v591_v4 = vld [vmem:[%s888_s1 + $0x28] sm:$0xff] }
   0x2   :  { %v601_v1 = vld [vmem:[%s888_s1 + $0x78] sm:$0xff]  ;;  %238 = vmatpush.bf16.msra.mxu0 %v593_v0  ;;  %v600_v3 = vld [vmem:[%s888_s1 + $0x70] sm:$0xff]  ;;  %649 = vmatpush.bf16.msra.mxu2 %v593_v0  ;;  %v599_v5 = vld [vmem:[%s888_s1 + $0x68] sm:$0xff] }
   0x3   :  { %287 = vmatpush.bf16.msra.mxu1 %v601_v1  ;;  %657 = vmatpush.bf16.msra.mxu3 %v601_v1  ;;  %v590_v6 = vld [vmem:[%s888_s1 + $0x20] sm:$0xff]  ;;  %v589_v8 = vld [vmem:[%s888_s1 + $0x18] sm:$0xff]  ;;  %v588_v10 = vld [vmem:[%s888_s1 + $0x10] sm:$0xff] }
   0x4   :  { %v598_v7 = vld [vmem:[%s888_s1 + $0x60] sm:$0xff]  ;;  %v597_v9 = vld [vmem:[%s888_s1 + $0x58] sm:$0xff]  ;;  %v596_v11 = vld [vmem:[%s888_s1 + $0x50] sm:$0xff] }
   0x5   :  { %v587_v12 = vld [vmem:[%s888_s1 + $0x8] sm:$0xff]  ;;  %v586_v14 = vld [vmem:[%s888_s1] sm:$0xff]  ;;  %v452_v28 = vld [vmem:[%s889_s0 + $0x10] sm:$0xf] }
   0x6   :  { %239 = vmatpush.bf16.msra.mxu0 %v592_v2  ;;  %650 = vmatpush.bf16.msra.mxu2 %v592_v2  ;;  %v595_v13 = vld [vmem:[%s888_s1 + $0x48] sm:$0xff]  ;;  %v594_v15 = vld [vmem:[%s888_s1 + $0x40] sm:$0xff]  ;;  %v573_v29 = vld [vmem:[%s889_s0 + $0x14] sm:$0xf0] }
   0x7   :  { %288 = vmatpush.bf16.msra.mxu1 %v600_v3  ;;  %658 = vmatpush.bf16.msra.mxu3 %v600_v3  ;;  %v444_v16 = vld [vmem:[%s889_s0] sm:$0xf]  ;;  %v571_v17 = vld [vmem:[%s889_s0 + $0x4] sm:$0xf0]  ;;  %v570_v18 = vld [vmem:[%s889_s0 + $0x4] sm:$0xf]  ;;  %v453_v36 = vor.u32 %v573_v29, %v452_v28 }
   0x8   :  { %v446_v19 = vld [vmem:[%s889_s0 + $0x8] sm:$0xf0]  ;;  %v476_v20 = vld [vmem:[%s889_s0 + $0x40] sm:$0xf]  ;;  %v579_v21 = vld [vmem:[%s889_s0 + $0x44] sm:$0xf0]  ;;  %v445_v24 = vor.u32 %v571_v17, %v444_v16 }
   0x9   :  { %v578_v22 = vld [vmem:[%s889_s0 + $0x44] sm:$0xf]  ;;  %v478_v23 = vld [vmem:[%s889_s0 + $0x48] sm:$0xf0]  ;;  %v449_v25 = vor.u32 %v570_v18, %v446_v19  ;;  %v477_v26 = vor.u32 %v579_v21, %v476_v20  ;;  %v572_v30 = vld [vmem:[%s889_s0 + $0x14] sm:$0xf] }
   0xa   :  { %240 = vmatpush.bf16.msra.mxu0 %v591_v4  ;;  %651 = vmatpush.bf16.msra.mxu2 %v591_v4  ;;  %v481_v27 = vor.u32 %v578_v22, %v478_v23  ;;  %v454_v31 = vld [vmem:[%s889_s0 + $0x18] sm:$0xf0]  ;;  %v484_v32 = vld [vmem:[%s889_s0 + $0x50] sm:$0xf]  ;;  %v581_v33 = vld [vmem:[%s889_s0 + $0x54] sm:$0xf0] }
   0xb   :  { %289 = vmatpush.bf16.msra.mxu1 %v599_v5  ;;  %659 = vmatpush.bf16.msra.mxu3 %v599_v5  ;;  %v580_v34 = vld [vmem:[%s889_s0 + $0x54] sm:$0xf]  ;;  %v486_v35 = vld [vmem:[%s889_s0 + $0x58] sm:$0xf0]  ;;  %v457_v37 = vor.u32 %v572_v30, %v454_v31  ;;  %v485_v38 = vor.u32 %v581_v33, %v484_v32  ;;  %v460_v40 = vld [vmem:[%s889_s0 + $0x20] sm:$0xf] }
   0xc   :  { %v489_v39 = vor.u32 %v580_v34, %v486_v35  ;;  %v575_v41 = vld [vmem:[%s889_s0 + $0x24] sm:$0xf0]  ;;  %v574_v42 = vld [vmem:[%s889_s0 + $0x24] sm:$0xf]  ;;  %v462_v43 = vld [vmem:[%s889_s0 + $0x28] sm:$0xf0] }
   0xd   :  { %v492_v44 = vld [vmem:[%s889_s0 + $0x60] sm:$0xf]  ;;  %v583_v45 = vld [vmem:[%s889_s0 + $0x64] sm:$0xf0]  ;;  %v582_v46 = vld [vmem:[%s889_s0 + $0x64] sm:$0xf]  ;;  %v461_v48 = vor.u32 %v575_v41, %v460_v40  ;;  %v465_v49 = vor.u32 %v574_v42, %v462_v43 }
   0xe   :  { %241 = vmatpush.bf16.msra.mxu0 %v590_v6  ;;  %652 = vmatpush.bf16.msra.mxu2 %v590_v6  ;;  %v494_v47 = vld [vmem:[%s889_s0 + $0x68] sm:$0xf0]  ;;  %v493_v50 = vor.u32 %v583_v45, %v492_v44  ;;  %v468_v52 = vld [vmem:[%s889_s0 + $0x30] sm:$0xf]  ;;  %v577_v53 = vld [vmem:[%s889_s0 + $0x34] sm:$0xf0] }
   0xf   :  { %290 = vmatpush.bf16.msra.mxu1 %v598_v7  ;;  %660 = vmatpush.bf16.msra.mxu3 %v598_v7  ;;  %v497_v51 = vor.u32 %v582_v46, %v494_v47  ;;  %v576_v54 = vld [vmem:[%s889_s0 + $0x34] sm:$0xf]  ;;  %v470_v55 = vld [vmem:[%s889_s0 + $0x38] sm:$0xf0]  ;;  %v500_v56 = vld [vmem:[%s889_s0 + $0x70] sm:$0xf]  ;;  %v469_v60 = vor.u32 %v577_v53, %v468_v52 }
  0x10   :  { %v585_v57 = vld [vmem:[%s889_s0 + $0x74] sm:$0xf0]  ;;  %v584_v58 = vld [vmem:[%s889_s0 + $0x74] sm:$0xf]  ;;  %v502_v59 = vld [vmem:[%s889_s0 + $0x78] sm:$0xf0]  ;;  %v473_v61 = vor.u32 %v576_v54, %v470_v55 }
  0x11   :  { %v501_v62 = vor.u32 %v585_v57, %v500_v56  ;;  %v505_v63 = vor.u32 %v584_v58, %v502_v59 }
  0x12   :  { %242 = vmatpush.bf16.msra.mxu0 %v589_v8  ;;  %653 = vmatpush.bf16.msra.mxu2 %v589_v8 }
  0x13   :  { %291 = vmatpush.bf16.msra.mxu1 %v597_v9  ;;  %661 = vmatpush.bf16.msra.mxu3 %v597_v9 }
  0x16   :  { %243 = vmatpush.bf16.msra.mxu0 %v588_v10  ;;  %654 = vmatpush.bf16.msra.mxu2 %v588_v10 }
  0x17   :  { %292 = vmatpush.bf16.msra.mxu1 %v596_v11  ;;  %662 = vmatpush.bf16.msra.mxu3 %v596_v11 }
  0x1a   :  { %244 = vmatpush.bf16.msra.mxu0 %v587_v12  ;;  %655 = vmatpush.bf16.msra.mxu2 %v587_v12 }
  0x1b   :  { %293 = vmatpush.bf16.msra.mxu1 %v595_v13  ;;  %663 = vmatpush.bf16.msra.mxu3 %v595_v13 }
  0x1e   :  { %245 = vmatpush.bf16.msra.mxu0 %v586_v14  ;;  %656 = vmatpush.bf16.msra.mxu2 %v586_v14 }
  0x1f   :  { %294 = vmatpush.bf16.msra.mxu1 %v594_v15  ;;  %664 = vmatpush.bf16.msra.mxu3 %v594_v15 }
  0x21   :  { %246 = vmatmul.bf16.vlgmr.msra.gmra.mxu0 %v445_v24  ;;  %266 = vmatmul.bf16.vlgmr.msra.gmra.mxu2 %v477_v26 }
  0x22   :  { %295 = vmatmul.bf16.vlgmr.msra.gmra.mxu1 %v449_v25  ;;  %315 = vmatmul.bf16.vlgmr.msra.gmra.mxu3 %v481_v27 }
  0x31   :  { %251 = vmatmul.bf16.gmra.mxu0 %v453_v36  ;;  %271 = vmatmul.bf16.gmra.mxu2 %v485_v38 }
  0x32   :  { %300 = vmatmul.bf16.gmra.mxu1 %v457_v37  ;;  %320 = vmatmul.bf16.gmra.mxu3 %v489_v39 }
  0x41   :  { %256 = vmatmul.bf16.gmra.mxu0 %v461_v48  ;;  %276 = vmatmul.bf16.gmra.mxu2 %v493_v50 }
  0x42   :  { %305 = vmatmul.bf16.gmra.mxu1 %v465_v49  ;;  %325 = vmatmul.bf16.gmra.mxu3 %v497_v51 }
  0x51   :  { %261 = vmatmul.bf16.gmra.mxu0 %v469_v60  ;;  %281 = vmatmul.bf16.gmra.mxu2 %v501_v62 }
  0x52   :  { %310 = vmatmul.bf16.gmra.mxu1 %v473_v61  ;;  %330 = vmatmul.bf16.gmra.mxu3 %v505_v63 }
  0x9e   :  { %v247_v0 = vpop.f32.mrf.mxu0 }
  0x9f   :  { %v296_v1 = vpop.f32.mrf.mxu1 }
  0xa0   :  { %v297_v6 = vadd.f32 %v296_v1, %v247_v0 }
  0xa2   :  { %v390_v39 = vmul.f32 %v297_v6, %v297_v6 }
  0xa4   :  { %v267_v2 = vpop.f32.mrf.mxu2 }
  0xa5   :  { %v316_v3 = vpop.f32.mrf.mxu3 }
  0xa6   :  { %v249_v4 = vpop.f32.mrf.mxu0  ;;  %v837_v9 = vadd.f32 %v316_v3, %v267_v2 }
  0xa7   :  { %v298_v5 = vpop.f32.mrf.mxu1 }
  0xa8   :  { %v299_v7 = vadd.f32 %v298_v5, %v249_v4 }
  0xaa   :  { %v605_v8 = vpack.c.bf16 %v299_v7, %v297_v6  ;;  %v391_v37 = vmul.f32 %v299_v7, %v299_v7  ;;  %v368_v40 = vadd.f32 %v299_v7, %v297_v6 }
  0xac   :  { %606 = vst [vmem:[%s890_s2] sm:$0xff] %v605_v8   ;;  %v269_v10 = vpop.f32.mrf.mxu2  ;;  %v406_v47 = vadd.f32 %v391_v37, %v390_v39  ;;  %v398_v8 = vmul.f32 %v837_v9, %v837_v9 }
  0xad   :  { %v318_v11 = vpop.f32.mrf.mxu3 }
  0xae   :  { %v252_v12 = vpop.f32.mrf.mxu0  ;;  %v839_v14 = vadd.f32 %v318_v11, %v269_v10 }
  0xaf   :  { %v301_v13 = vpop.f32.mrf.mxu1 }
  0xb0   :  { %v625_v15 = vpack.c.bf16 %v839_v14, %v837_v9  ;;  %v302_v20 = vadd.f32 %v301_v13, %v252_v12  ;;  %v399_v13 = vmul.f32 %v839_v14, %v839_v14 }
  0xb2   :  { %645 = vst [vmem:[%s890_s2 + $0x20] sm:$0xff] %v625_v15   ;;  %v392_v41 = vmul.f32 %v302_v20, %v302_v20  ;;  %v369_v48 = vadd.f32 %v368_v40, %v302_v20 }
  0xb4   :  { %v272_v16 = vpop.f32.mrf.mxu2  ;;  %v407_v51 = vadd.f32 %v406_v47, %v392_v41 }
  0xb5   :  { %v321_v17 = vpop.f32.mrf.mxu3 }
  0xb6   :  { %v254_v18 = vpop.f32.mrf.mxu0  ;;  %v849_v23 = vadd.f32 %v321_v17, %v272_v16 }
  0xb7   :  { %v303_v19 = vpop.f32.mrf.mxu1 }
  0xb8   :  { %v304_v21 = vadd.f32 %v303_v19, %v254_v18 }
  0xba   :  { %v610_v22 = vpack.c.bf16 %v304_v21, %v302_v20  ;;  %v393_v49 = vmul.f32 %v304_v21, %v304_v21  ;;  %v370_v52 = vadd.f32 %v369_v48, %v304_v21  ;;  %v400_v20 = vmul.f32 %v849_v23, %v849_v23 }
  0xbc   :  { %642 = vst [vmem:[%s890_s2 + $0x8] sm:$0xff] %v610_v22   ;;  %v274_v24 = vpop.f32.mrf.mxu2  ;;  %v408_v55 = vadd.f32 %v407_v51, %v393_v49 }
  0xbd   :  { %v323_v25 = vpop.f32.mrf.mxu3 }
  0xbe   :  { %v257_v26 = vpop.f32.mrf.mxu0  ;;  %v851_v28 = vadd.f32 %v323_v25, %v274_v24 }
  0xbf   :  { %v306_v27 = vpop.f32.mrf.mxu1 }
  0xc0   :  { %v630_v29 = vpack.c.bf16 %v851_v28, %v849_v23  ;;  %v307_v34 = vadd.f32 %v306_v27, %v257_v26 }
  0xc2   :  { %646 = vst [vmem:[%s890_s2 + $0x28] sm:$0xff] %v630_v29   ;;  %v394_v53 = vmul.f32 %v307_v34, %v307_v34  ;;  %v371_v56 = vadd.f32 %v370_v52, %v307_v34 }
  0xc4   :  { %v277_v30 = vpop.f32.mrf.mxu2  ;;  %v409_v58 = vadd.f32 %v408_v55, %v394_v53 }
  0xc5   :  { %v326_v31 = vpop.f32.mrf.mxu3 }
  0xc6   :  { %v259_v32 = vpop.f32.mrf.mxu0  ;;  %v327_v38 = vadd.f32 %v326_v31, %v277_v30 }
  0xc7   :  { %v308_v33 = vpop.f32.mrf.mxu1 }
  0xc8   :  { %v309_v35 = vadd.f32 %v308_v33, %v259_v32 }
  0xca   :  { %v615_v36 = vpack.c.bf16 %v309_v35, %v307_v34  ;;  %v395_v57 = vmul.f32 %v309_v35, %v309_v35  ;;  %v372_v59 = vadd.f32 %v371_v56, %v309_v35 }
  0xcc   :  { %643 = vst [vmem:[%s890_s2 + $0x10] sm:$0xff] %v615_v36   ;;  %v279_v42 = vpop.f32.mrf.mxu2  ;;  %v410_v1 = vadd.f32 %v409_v58, %v395_v57 }
  0xcd   :  { %v328_v43 = vpop.f32.mrf.mxu3 }
  0xce   :  { %v262_v44 = vpop.f32.mrf.mxu0  ;;  %v329_v46 = vadd.f32 %v328_v43, %v279_v42 }
  0xcf   :  { %v311_v45 = vpop.f32.mrf.mxu1 }
  0xd0   :  { %v635_v50 = vpack.c.bf16 %v329_v46, %v327_v38  ;;  %v312_v54 = vadd.f32 %v311_v45, %v262_v44  ;;  %v403_v30 = vmul.f32 %v329_v46, %v329_v46 }
  0xd2   :  { %647 = vst [vmem:[%s890_s2 + $0x30] sm:$0xff] %v635_v50   ;;  %v396_v60 = vmul.f32 %v312_v54, %v312_v54  ;;  %v373_v2 = vadd.f32 %v372_v59, %v312_v54 }
  0xd4   :  { %v282_v61 = vpop.f32.mrf.mxu2  ;;  %v411_v4 = vadd.f32 %v410_v1, %v396_v60 }
  0xd5   :  { %v331_v62 = vpop.f32.mrf.mxu3 }
  0xd6   :  { %v264_v63 = vpop.f32.mrf.mxu0  ;;  %v332_v12 = vadd.f32 %v331_v62, %v282_v61 }
  0xd7   :  { %v313_v0 = vpop.f32.mrf.mxu1 }
  0xd8   :  { %v314_v3 = vadd.f32 %v313_v0, %v264_v63 }
  0xda   :  { %v620_v5 = vpack.c.bf16 %v314_v3, %v312_v54  ;;  %v374_v6 = vadd.f32 %v373_v2, %v314_v3  ;;  %v397_v7 = vmul.f32 %v314_v3, %v314_v3 }
  0xdc   :  { %644 = vst [vmem:[%s890_s2 + $0x18] sm:$0xff] %v620_v5   ;;  %v375_v10 = vadd.f32 %v374_v6, %v837_v9  ;;  %v412_v11 = vadd.f32 %v411_v4, %v397_v7  ;;  %v284_v17 = vpop.f32.mrf.mxu2  ;;  %v401_v9 = vmul.f32 %v851_v28, %v851_v28 }
  0xdd   :  { %v333_v18 = vpop.f32.mrf.mxu3 }
  0xde   :  { %v376_v15 = vadd.f32 %v375_v10, %v839_v14  ;;  %v413_v16 = vadd.f32 %v412_v11, %v398_v8  ;;  %v334_v19 = vadd.f32 %v333_v18, %v284_v17  ;;  %v402_v14 = vmul.f32 %v327_v38, %v327_v38 }
  0xe0   :  { %v377_v21 = vadd.f32 %v376_v15, %v849_v23  ;;  %v414_v22 = vadd.f32 %v413_v16, %v399_v13  ;;  %v640_v24 = vpack.c.bf16 %v334_v19, %v332_v12  ;;  %v404_v23 = vmul.f32 %v332_v12, %v332_v12 }
  0xe1   :  { %v405_v37 = vmul.f32 %v334_v19, %v334_v19 }
  0xe2   :  { %v415_v25 = vadd.f32 %v414_v22, %v400_v20  ;;  %v378_v26 = vadd.f32 %v377_v21, %v851_v28  ;;  %648 = vst [vmem:[%s890_s2 + $0x38] sm:$0xff] %v640_v24  }
  0xe4   :  { %v379_v27 = vadd.f32 %v378_v26, %v327_v38  ;;  %v416_v29 = vadd.f32 %v415_v25, %v401_v9 }
  0xe6   :  { %v380_v31 = vadd.f32 %v379_v27, %v329_v46  ;;  %v417_v32 = vadd.f32 %v416_v29, %v402_v14 }
  0xe8   :  { %v381_v33 = vadd.f32 %v380_v31, %v332_v12  ;;  %v418_v34 = vadd.f32 %v417_v32, %v403_v30 }
  0xea   :  { %v419_v35 = vadd.f32 %v418_v34, %v404_v23  ;;  %v382_v36 = vadd.f32 %v381_v33, %v334_v19 }
  0xec   :  { %v383_v39 = vrot.slane %v382_v36, 4  ;;  %v420_v40 = vadd.f32 %v419_v35, %v405_v37 }
  0xee   :  { %v384_v41 = vadd.f32 %v383_v39, %v382_v36  ;;  %v421_v28 = vrot.slane %v420_v40, 4 }
  0xf0   :  { %v385_v42 = vrot.slane %v384_v41, 2  ;;  %v422_v43 = vadd.f32 %v421_v28, %v420_v40 }
  0xf2   :  { %v386_v44 = vadd.f32 %v385_v42, %v384_v41  ;;  %v423_v45 = vrot.slane %v422_v43, 2 }
  0xf4   :  { %v387_v47 = vrot.slane %v386_v44, 1  ;;  %v424_v38 = vadd.f32 %v423_v45, %v422_v43 }
  0xf6   :  { %v388_v48 = vadd.f32 %v387_v47, %v386_v44  ;;  %v425_v49 = vrot.slane %v424_v38, 1 }
  0xf8   :  { %v389_v46 = vmul.f32 0.125, %v388_v48  ;;  %v426_v50 = vadd.f32 %v425_v49, %v424_v38 }
  0xfa   :  { %v427_v51 = vmul.f32 0.125, %v426_v50  ;;  %428 = vst [vmem:[%s891_s3] sm:$0xff] %v389_v46 }
  0xfc   :  { %429 = vst [vmem:[%s892_s4] sm:$0xff] %v427_v51 }

// kernel: discr_forward.10
= control target key start
LH: loop header
LB: loop body
LE: loop exit
PB: predicated region body
PF: predicated region fallthrough
CT: control target
= control target key end

     0   :  { %s175_s1 = inlined_call_operand.vmem [shape: f32[8,128], index: 1, kind: input, shape index: {}]   ;;  %s176_s2 = inlined_call_operand.vmem [shape: f32[8,128], index: 2, kind: input, shape index: {}]   ;;  %s177_s0 = inlined_call_operand.vmem [shape: bf16[32,128], index: 0, kind: input, shape index: {}]   ;;  %s178_s3 = inlined_call_operand.vmem [shape: f32[1,128], index: 3, kind: input, shape index: {}]   ;;  %s179_s4 = inlined_call_operand.vmem [shape: f32[1,128], index: 4, kind: input, shape index: {}]   ;;  %s180_s5 = inlined_call_operand.vmem [shape: bf16[32,128], index: 5, kind: output, shape index: {}]  }
   0x1   :  { %v20_v0 = vld [vmem:[%s175_s1] sm:$0xff]  ;;  %v117_v28 = vld [vmem:[%s177_s0 + $0x8] sm:$0xff]  }
   0x2   :  { %v28_v1 = vld [vmem:[%s176_s2] sm:$0xff]  ;;  %v21_v2 = vrot.slane %v20_v0, 4  ;;  %v105_v33 = vunpack.c.l.bf16 %v117_v28  ;;  %v106_v35 = vunpack.c.h.bf16 %v117_v28 }
   0x3   :  { %v29_v3 = vrot.slane %v28_v1, 4  ;;  %v50_v26 = vld [vmem:[%s178_s3] sm:$0x1] }
   0x4   :  { %v22_v4 = vadd.f32 %v21_v2, %v20_v0  ;;  %v100_v27 = vld [vmem:[%s177_s0] sm:$0xff]  }
   0x5   :  { %v30_v5 = vadd.f32 %v29_v3, %v28_v1  ;;  %v101_v31 = vunpack.c.l.bf16 %v100_v27  ;;  %v102_v32 = vunpack.c.h.bf16 %v100_v27  ;;  %v52_v34 = vld [vmem:[%s179_s4] sm:$0x1] }
   0x6   :  { %v23_v6 = vrot.slane %v22_v4, 2 }
   0x7   :  { %v31_v7 = vrot.slane %v30_v5, 2 }
   0x8   :  { %v24_v8 = vadd.f32 %v23_v6, %v22_v4 }
   0x9   :  { %v32_v9 = vadd.f32 %v31_v7, %v30_v5 }
   0xa   :  { %v25_v10 = vrot.slane %v24_v8, 1 }
   0xb   :  { %v33_v11 = vrot.slane %v32_v9, 1 }
   0xc   :  { %v26_v12 = vadd.f32 %v25_v10, %v24_v8 }
   0xd   :  { %v34_v13 = vadd.f32 %v33_v11, %v32_v9 }
   0xe   :  { %v27_v14 = vmul.f32 0.03125, %v26_v12 }
   0xf   :  { %v35_v15 = vmul.f32 0.03125, %v34_v13 }
  0x10   :  { %v36_v16 = vmul.f32 %v27_v14, %v27_v14 }
  0x12   :  { %v37_v17 = vsub.f32 %v35_v15, %v36_v16 }
  0x14   :  { %v38_v18 = vmax.f32 %v37_v17, 0.0 }
  0x16   :  { %v39_v19 = vadd.f32 1e-05, %v38_v18 }
  0x18   :  { %119 = vrsqrt.f32 %v39_v19  ;;  %vm46_vm0 = vweird.f32 %v39_v19 }
  0x1e   :  { %v120_v20 = vpop.eup %119 }
  0x1f   :  { %v41_v21 = vmul.f32 %v120_v20, %v39_v19  ;;  %vm47_vm1 = vweird.f32 %v120_v20 }
  0x20   :  { %vm48_vm2 = vmor %vm46_vm0, %vm47_vm1 }
  0x21   :  { %v42_v22 = vmul.f32 %v120_v20, %v41_v21 }
  0x23   :  { %v43_v23 = vmul.f32 0.5, %v42_v22 }
  0x25   :  { %v44_v24 = vsub.f32 1.5, %v43_v23 }
  0x27   :  { %v45_v25 = vmul.f32 %v120_v20, %v44_v24 }
  0x29   :  { %v49_v29 = vsel %vm48_vm2, %v120_v20, %v45_v25 }
  0x2a   :  { %v51_v30 = vmul.f32 %v50_v26, %v49_v29 }
  0x2c   :  { %v53_v36 = vmul.f32 %v51_v30, %v27_v14  ;;  %v63_v37 = vperm.slane %v51_v30, 0 }
  0x2e   :  { %v54_v38 = vsub.f32 %v52_v34, %v53_v36  ;;  %v64_v39 = vmul.f32 %v101_v31, %v63_v37  ;;  %v65_v40 = vmul.f32 %v102_v32, %v63_v37  ;;  %v66_v41 = vmul.f32 %v105_v33, %v63_v37 }
  0x2f   :  { %v67_v42 = vmul.f32 %v106_v35, %v63_v37 }
  0x30   :  { %v69_v43 = vperm.slane %v54_v38, 0 }
  0x32   :  { %v71_v44 = vadd.f32 %v69_v43, %v64_v39  ;;  %v72_v45 = vadd.f32 %v69_v43, %v65_v40  ;;  %v73_v46 = vadd.f32 %v69_v43, %v66_v41  ;;  %v74_v47 = vadd.f32 %v69_v43, %v67_v42 }
  0x34   :  { %vm75_vm3 = vcmp.gt.f32.partialorder %v71_v44, 0.0  ;;  %vm76_vm4 = vcmp.gt.f32.partialorder %v72_v45, 0.0  ;;  %v79_v48 = vmul.f32 0.2, %v71_v44  ;;  %v80_v49 = vmul.f32 0.2, %v72_v45 }
  0x35   :  { %vm77_vm5 = vcmp.gt.f32.partialorder %v73_v46, 0.0  ;;  %vm78_vm6 = vcmp.gt.f32.partialorder %v74_v47, 0.0  ;;  %v81_v50 = vmul.f32 0.2, %v73_v46  ;;  %v82_v51 = vmul.f32 0.2, %v74_v47 }
  0x36   :  { %v83_v52 = vsel %vm75_vm3, %v71_v44, %v79_v48  ;;  %v84_v53 = vsel %vm76_vm4, %v72_v45, %v80_v49 }
  0x37   :  { %v110_v54 = vpack.c.bf16 %v84_v53, %v83_v52  ;;  %v85_v55 = vsel %vm77_vm5, %v73_v46, %v81_v50  ;;  %v86_v56 = vsel %vm78_vm6, %v74_v47, %v82_v51 }
  0x38   :  { %v115_v57 = vpack.c.bf16 %v86_v56, %v85_v55 }
  0x39   :  { %111 = vst [vmem:[%s180_s5] sm:$0xff] %v110_v54  }
  0x3a   :  { %118 = vst [vmem:[%s180_s5 + $0x8] sm:$0xff] %v115_v57  }

// kernel: discr_forward.9
= control target key start
LH: loop header
LB: loop body
LE: loop exit
PB: predicated region body
PF: predicated region fallthrough
CT: control target
= control target key end

     0   :  { %s832_s1 = inlined_call_operand.vmem [shape: bf16[512,128], index: 1, kind: input, shape index: {}]   ;;  %s833_s0 = inlined_call_operand.vmem [shape: bf16[32,512], index: 0, kind: input, shape index: {}]   ;;  %s834_s2 = inlined_call_operand.vmem [shape: bf16[32,128], index: 2, kind: output, shape index: {0}]   ;;  %s835_s3 = inlined_call_operand.vmem [shape: f32[8,128], index: 3, kind: output, shape index: {1}]   ;;  %s836_s4 = inlined_call_operand.vmem [shape: f32[8,128], index: 4, kind: output, shape index: {2}]  }
   0x1   :  { %v615_v0 = vld [vmem:[%s832_s1 + $0x38] sm:$0xff]  ;;  %v614_v4 = vld [vmem:[%s832_s1 + $0x30] sm:$0xff]  ;;  %v613_v8 = vld [vmem:[%s832_s1 + $0x28] sm:$0xff] }
   0x2   :  { %v623_v1 = vld [vmem:[%s832_s1 + $0x78] sm:$0xff]  ;;  %318 = vmatpush.bf16.msra.mxu0 %v615_v0  ;;  %v622_v5 = vld [vmem:[%s832_s1 + $0x70] sm:$0xff]  ;;  %v621_v9 = vld [vmem:[%s832_s1 + $0x68] sm:$0xff] }
   0x3   :  { %v631_v2 = vld [vmem:[%s832_s1 + $0xb8] sm:$0xff]  ;;  %337 = vmatpush.bf16.msra.mxu1 %v623_v1  ;;  %v630_v6 = vld [vmem:[%s832_s1 + $0xb0] sm:$0xff]  ;;  %v629_v10 = vld [vmem:[%s832_s1 + $0xa8] sm:$0xff] }
   0x4   :  { %v639_v3 = vld [vmem:[%s832_s1 + $0xf8] sm:$0xff]  ;;  %356 = vmatpush.bf16.msra.mxu2 %v631_v2  ;;  %v638_v7 = vld [vmem:[%s832_s1 + $0xf0] sm:$0xff]  ;;  %v637_v11 = vld [vmem:[%s832_s1 + $0xe8] sm:$0xff] }
   0x5   :  { %375 = vmatpush.bf16.msra.mxu3 %v639_v3  ;;  %v612_v12 = vld [vmem:[%s832_s1 + $0x20] sm:$0xff]  ;;  %v611_v16 = vld [vmem:[%s832_s1 + $0x18] sm:$0xff]  ;;  %v610_v20 = vld [vmem:[%s832_s1 + $0x10] sm:$0xff] }
   0x6   :  { %319 = vmatpush.bf16.msra.mxu0 %v614_v4  ;;  %v620_v13 = vld [vmem:[%s832_s1 + $0x60] sm:$0xff]  ;;  %v619_v17 = vld [vmem:[%s832_s1 + $0x58] sm:$0xff]  ;;  %v618_v21 = vld [vmem:[%s832_s1 + $0x50] sm:$0xff] }
   0x7   :  { %338 = vmatpush.bf16.msra.mxu1 %v622_v5  ;;  %v628_v14 = vld [vmem:[%s832_s1 + $0xa0] sm:$0xff]  ;;  %v627_v18 = vld [vmem:[%s832_s1 + $0x98] sm:$0xff]  ;;  %v626_v22 = vld [vmem:[%s832_s1 + $0x90] sm:$0xff] }
   0x8   :  { %357 = vmatpush.bf16.msra.mxu2 %v630_v6  ;;  %v636_v15 = vld [vmem:[%s832_s1 + $0xe0] sm:$0xff]  ;;  %v635_v19 = vld [vmem:[%s832_s1 + $0xd8] sm:$0xff]  ;;  %v634_v23 = vld [vmem:[%s832_s1 + $0xd0] sm:$0xff] }
   0x9   :  { %376 = vmatpush.bf16.msra.mxu3 %v638_v7  ;;  %v609_v24 = vld [vmem:[%s832_s1 + $0x8] sm:$0xff]  ;;  %v608_v28 = vld [vmem:[%s832_s1] sm:$0xff]  ;;  %v602_v33 = vld [vmem:[%s833_s0 + $0xc] sm:$0xf0] }
   0xa   :  { %320 = vmatpush.bf16.msra.mxu0 %v613_v8  ;;  %v617_v25 = vld [vmem:[%s832_s1 + $0x48] sm:$0xff]  ;;  %v616_v29 = vld [vmem:[%s832_s1 + $0x40] sm:$0xff]  ;;  %v444_v35 = vld [vmem:[%s833_s0 + $0x10] sm:$0xf0] }
   0xb   :  { %339 = vmatpush.bf16.msra.mxu1 %v621_v9  ;;  %v625_v26 = vld [vmem:[%s832_s1 + $0x88] sm:$0xff]  ;;  %v624_v30 = vld [vmem:[%s832_s1 + $0x80] sm:$0xff]  ;;  %v603_v37 = vld [vmem:[%s833_s0 + $0x14] sm:$0xf0] }
   0xc   :  { %358 = vmatpush.bf16.msra.mxu2 %v629_v10  ;;  %v633_v27 = vld [vmem:[%s832_s1 + $0xc8] sm:$0xff]  ;;  %v632_v31 = vld [vmem:[%s832_s1 + $0xc0] sm:$0xff]  ;;  %v452_v39 = vld [vmem:[%s833_s0 + $0x18] sm:$0xf0] }
   0xd   :  { %377 = vmatpush.bf16.msra.mxu3 %v637_v11  ;;  %v442_v32 = vld [vmem:[%s833_s0] sm:$0xf]  ;;  %v600_v34 = vld [vmem:[%s833_s0 + $0x4] sm:$0xf]  ;;  %v450_v36 = vld [vmem:[%s833_s0 + $0x8] sm:$0xf] }
   0xe   :  { %321 = vmatpush.bf16.msra.mxu0 %v612_v12  ;;  %v601_v38 = vld [vmem:[%s833_s0 + $0xc] sm:$0xf]  ;;  %v443_v40 = vor.u32 %v602_v33, %v442_v32  ;;  %v447_v41 = vor.u32 %v600_v34, %v444_v35  ;;  %v451_v42 = vor.u32 %v603_v37, %v450_v36  ;;  %v458_v44 = vld [vmem:[%s833_s0 + $0x20] sm:$0xf]  ;;  %v606_v45 = vld [vmem:[%s833_s0 + $0x2c] sm:$0xf0] }
   0xf   :  { %340 = vmatpush.bf16.msra.mxu1 %v620_v13  ;;  %v455_v43 = vor.u32 %v601_v38, %v452_v39  ;;  %v604_v46 = vld [vmem:[%s833_s0 + $0x24] sm:$0xf]  ;;  %v460_v47 = vld [vmem:[%s833_s0 + $0x30] sm:$0xf0]  ;;  %v466_v48 = vld [vmem:[%s833_s0 + $0x28] sm:$0xf]  ;;  %v459_v52 = vor.u32 %v606_v45, %v458_v44 }
  0x10   :  { %359 = vmatpush.bf16.msra.mxu2 %v628_v14  ;;  %v607_v49 = vld [vmem:[%s833_s0 + $0x34] sm:$0xf0]  ;;  %v605_v50 = vld [vmem:[%s833_s0 + $0x2c] sm:$0xf]  ;;  %v468_v51 = vld [vmem:[%s833_s0 + $0x38] sm:$0xf0]  ;;  %v463_v53 = vor.u32 %v604_v46, %v460_v47 }
  0x11   :  { %378 = vmatpush.bf16.msra.mxu3 %v636_v15  ;;  %v467_v54 = vor.u32 %v607_v49, %v466_v48  ;;  %v471_v55 = vor.u32 %v605_v50, %v468_v51 }
  0x12   :  { %322 = vmatpush.bf16.msra.mxu0 %v611_v16 }
  0x13   :  { %341 = vmatpush.bf16.msra.mxu1 %v619_v17 }
  0x14   :  { %360 = vmatpush.bf16.msra.mxu2 %v627_v18 }
  0x15   :  { %379 = vmatpush.bf16.msra.mxu3 %v635_v19 }
  0x16   :  { %323 = vmatpush.bf16.msra.mxu0 %v610_v20 }
  0x17   :  { %342 = vmatpush.bf16.msra.mxu1 %v618_v21 }
  0x18   :  { %361 = vmatpush.bf16.msra.mxu2 %v626_v22 }
  0x19   :  { %380 = vmatpush.bf16.msra.mxu3 %v634_v23 }
  0x1a   :  { %324 = vmatpush.bf16.msra.mxu0 %v609_v24 }
  0x1b   :  { %343 = vmatpush.bf16.msra.mxu1 %v617_v25 }
  0x1c   :  { %362 = vmatpush.bf16.msra.mxu2 %v625_v26 }
  0x1d   :  { %381 = vmatpush.bf16.msra.mxu3 %v633_v27 }
  0x1e   :  { %325 = vmatpush.bf16.msra.mxu0 %v608_v28 }
  0x1f   :  { %344 = vmatpush.bf16.msra.mxu1 %v616_v29 }
  0x20   :  { %363 = vmatpush.bf16.msra.mxu2 %v624_v30 }
  0x21   :  { %382 = vmatpush.bf16.msra.mxu3 %v632_v31  ;;  %326 = vmatmul.bf16.vlgmr.msra.gmra.mxu0 %v443_v40 }
  0x22   :  { %345 = vmatmul.bf16.vlgmr.msra.gmra.mxu1 %v447_v41 }
  0x23   :  { %364 = vmatmul.bf16.vlgmr.msra.gmra.mxu2 %v451_v42 }
  0x24   :  { %383 = vmatmul.bf16.vlgmr.msra.gmra.mxu3 %v455_v43 }
  0x31   :  { %331 = vmatmul.bf16.gmra.mxu0 %v459_v52 }
  0x32   :  { %350 = vmatmul.bf16.gmra.mxu1 %v463_v53 }
  0x33   :  { %369 = vmatmul.bf16.gmra.mxu2 %v467_v54 }
  0x34   :  { %388 = vmatmul.bf16.gmra.mxu3 %v471_v55 }
  0x9e   :  { %v327_v56 = vpop.f32.mrf.mxu0 }
  0x9f   :  { %v346_v57 = vpop.f32.mrf.mxu1 }
  0xa0   :  { %v347_v62 = vadd.f32 %v346_v57, %v327_v56 }
  0xa6   :  { %v365_v58 = vpop.f32.mrf.mxu2  ;;  %v329_v60 = vpop.f32.mrf.mxu0 }
  0xa7   :  { %v384_v59 = vpop.f32.mrf.mxu3  ;;  %v348_v61 = vpop.f32.mrf.mxu1  ;;  %v366_v63 = vadd.f32 %v365_v58, %v347_v62 }
  0xa8   :  { %v349_v0 = vadd.f32 %v348_v61, %v329_v60 }
  0xa9   :  { %v385_v6 = vadd.f32 %v384_v59, %v366_v63 }
  0xab   :  { %v412_v19 = vmul.f32 %v385_v6, %v385_v6 }
  0xae   :  { %v367_v1 = vpop.f32.mrf.mxu2  ;;  %v332_v4 = vpop.f32.mrf.mxu0 }
  0xaf   :  { %v386_v2 = vpop.f32.mrf.mxu3  ;;  %v368_v3 = vadd.f32 %v367_v1, %v349_v0  ;;  %v351_v5 = vpop.f32.mrf.mxu1 }
  0xb0   :  { %v352_v9 = vadd.f32 %v351_v5, %v332_v4 }
  0xb1   :  { %v387_v7 = vadd.f32 %v386_v2, %v368_v3 }
  0xb3   :  { %v643_v8 = vpack.c.bf16 %v387_v7, %v385_v6  ;;  %v413_v16 = vmul.f32 %v387_v7, %v387_v7  ;;  %v402_v20 = vadd.f32 %v387_v7, %v385_v6 }
  0xb5   :  { %644 = vst [vmem:[%s834_s2] sm:$0xff] %v643_v8   ;;  %v416_v24 = vadd.f32 %v413_v16, %v412_v19 }
  0xb6   :  { %v370_v10 = vpop.f32.mrf.mxu2  ;;  %v334_v13 = vpop.f32.mrf.mxu0 }
  0xb7   :  { %v389_v11 = vpop.f32.mrf.mxu3  ;;  %v371_v12 = vadd.f32 %v370_v10, %v352_v9  ;;  %v353_v14 = vpop.f32.mrf.mxu1 }
  0xb8   :  { %v354_v17 = vadd.f32 %v353_v14, %v334_v13 }
  0xb9   :  { %v390_v15 = vadd.f32 %v389_v11, %v371_v12 }
  0xbb   :  { %v414_v21 = vmul.f32 %v390_v15, %v390_v15  ;;  %v403_v25 = vadd.f32 %v402_v20, %v390_v15 }
  0xbd   :  { %v417_v27 = vadd.f32 %v416_v24, %v414_v21 }
  0xbe   :  { %v372_v18 = vpop.f32.mrf.mxu2 }
  0xbf   :  { %v373_v22 = vadd.f32 %v372_v18, %v354_v17  ;;  %v391_v23 = vpop.f32.mrf.mxu3 }
  0xc1   :  { %v392_v26 = vadd.f32 %v391_v23, %v373_v22 }
  0xc3   :  { %v648_v28 = vpack.c.bf16 %v392_v26, %v390_v15  ;;  %v404_v29 = vadd.f32 %v403_v25, %v392_v26  ;;  %v415_v30 = vmul.f32 %v392_v26, %v392_v26 }
  0xc5   :  { %650 = vst [vmem:[%s834_s2 + $0x8] sm:$0xff] %v648_v28   ;;  %v405_v31 = vrot.slane %v404_v29, 4  ;;  %v418_v32 = vadd.f32 %v417_v27, %v415_v30 }
  0xc7   :  { %v406_v33 = vadd.f32 %v405_v31, %v404_v29  ;;  %v419_v34 = vrot.slane %v418_v32, 4 }
  0xc9   :  { %v407_v35 = vrot.slane %v406_v33, 2  ;;  %v420_v36 = vadd.f32 %v419_v34, %v418_v32 }
  0xcb   :  { %v408_v37 = vadd.f32 %v407_v35, %v406_v33  ;;  %v421_v38 = vrot.slane %v420_v36, 2 }
  0xcd   :  { %v409_v39 = vrot.slane %v408_v37, 1  ;;  %v422_v40 = vadd.f32 %v421_v38, %v420_v36 }
  0xcf   :  { %v410_v41 = vadd.f32 %v409_v39, %v408_v37  ;;  %v423_v42 = vrot.slane %v422_v40, 1 }
  0xd1   :  { %v411_v43 = vmul.f32 0.125, %v410_v41  ;;  %v424_v44 = vadd.f32 %v423_v42, %v422_v40 }
  0xd3   :  { %v425_v45 = vmul.f32 0.125, %v424_v44  ;;  %426 = vst [vmem:[%s835_s3] sm:$0xff] %v411_v43 }
  0xd5   :  { %427 = vst [vmem:[%s836_s4] sm:$0xff] %v425_v45 }

// kernel: discr_forward.11
= control target key start
LH: loop header
LB: loop body
LE: loop exit
PB: predicated region body
PF: predicated region fallthrough
CT: control target
= control target key end

     0   :  { %s1356_s1 = inlined_call_operand.vmem [shape: bf16[1024,128], index: 1, kind: input, shape index: {}]   ;;  %s1357_s0 = inlined_call_operand.vmem [shape: bf16[16,1024], index: 0, kind: input, shape index: {}]   ;;  %s1358_s2 = inlined_call_operand.vmem [shape: f32[16,128], index: 2, kind: output, shape index: {}]  }
   0x1   :  { %v1030_v0 = vld [vmem:[%s1356_s1 + $0x38] sm:$0xff]  ;;  %v1029_v4 = vld [vmem:[%s1356_s1 + $0x30] sm:$0xff]  ;;  %v1028_v8 = vld [vmem:[%s1356_s1 + $0x28] sm:$0xff] }
   0x2   :  { %v1038_v1 = vld [vmem:[%s1356_s1 + $0x78] sm:$0xff]  ;;  %571 = vmatpush.bf16.msra.mxu0 %v1030_v0  ;;  %v1037_v5 = vld [vmem:[%s1356_s1 + $0x70] sm:$0xff]  ;;  %v1036_v9 = vld [vmem:[%s1356_s1 + $0x68] sm:$0xff] }
   0x3   :  { %v1046_v2 = vld [vmem:[%s1356_s1 + $0xb8] sm:$0xff]  ;;  %585 = vmatpush.bf16.msra.mxu1 %v1038_v1  ;;  %v1045_v6 = vld [vmem:[%s1356_s1 + $0xb0] sm:$0xff]  ;;  %v1044_v10 = vld [vmem:[%s1356_s1 + $0xa8] sm:$0xff] }
   0x4   :  { %v1054_v3 = vld [vmem:[%s1356_s1 + $0xf8] sm:$0xff]  ;;  %599 = vmatpush.bf16.msra.mxu2 %v1046_v2  ;;  %v1053_v7 = vld [vmem:[%s1356_s1 + $0xf0] sm:$0xff]  ;;  %v1052_v11 = vld [vmem:[%s1356_s1 + $0xe8] sm:$0xff] }
   0x5   :  { %613 = vmatpush.bf16.msra.mxu3 %v1054_v3  ;;  %v1027_v12 = vld [vmem:[%s1356_s1 + $0x20] sm:$0xff]  ;;  %v1026_v16 = vld [vmem:[%s1356_s1 + $0x18] sm:$0xff]  ;;  %v1025_v20 = vld [vmem:[%s1356_s1 + $0x10] sm:$0xff] }
   0x6   :  { %572 = vmatpush.bf16.msra.mxu0 %v1029_v4  ;;  %v1035_v13 = vld [vmem:[%s1356_s1 + $0x60] sm:$0xff]  ;;  %v1034_v17 = vld [vmem:[%s1356_s1 + $0x58] sm:$0xff]  ;;  %v1033_v21 = vld [vmem:[%s1356_s1 + $0x50] sm:$0xff] }
   0x7   :  { %586 = vmatpush.bf16.msra.mxu1 %v1037_v5  ;;  %v1043_v14 = vld [vmem:[%s1356_s1 + $0xa0] sm:$0xff]  ;;  %v1042_v18 = vld [vmem:[%s1356_s1 + $0x98] sm:$0xff]  ;;  %v1041_v22 = vld [vmem:[%s1356_s1 + $0x90] sm:$0xff] }
   0x8   :  { %600 = vmatpush.bf16.msra.mxu2 %v1045_v6  ;;  %v1051_v15 = vld [vmem:[%s1356_s1 + $0xe0] sm:$0xff]  ;;  %v1050_v19 = vld [vmem:[%s1356_s1 + $0xd8] sm:$0xff]  ;;  %v1049_v23 = vld [vmem:[%s1356_s1 + $0xd0] sm:$0xff] }
   0x9   :  { %614 = vmatpush.bf16.msra.mxu3 %v1053_v7  ;;  %v1024_v24 = vld [vmem:[%s1356_s1 + $0x8] sm:$0xff]  ;;  %v1023_v28 = vld [vmem:[%s1356_s1] sm:$0xff]  ;;  %v1062_v32 = vld [vmem:[%s1356_s1 + $0x138] sm:$0xff] }
   0xa   :  { %573 = vmatpush.bf16.msra.mxu0 %v1028_v8  ;;  %v1032_v25 = vld [vmem:[%s1356_s1 + $0x48] sm:$0xff]  ;;  %v1031_v29 = vld [vmem:[%s1356_s1 + $0x40] sm:$0xff]  ;;  %v1070_v33 = vld [vmem:[%s1356_s1 + $0x178] sm:$0xff] }
   0xb   :  { %587 = vmatpush.bf16.msra.mxu1 %v1036_v9  ;;  %v1040_v26 = vld [vmem:[%s1356_s1 + $0x88] sm:$0xff]  ;;  %v1039_v30 = vld [vmem:[%s1356_s1 + $0x80] sm:$0xff]  ;;  %v1078_v42 = vld [vmem:[%s1356_s1 + $0x1b8] sm:$0xff] }
   0xc   :  { %601 = vmatpush.bf16.msra.mxu2 %v1044_v10  ;;  %v1048_v27 = vld [vmem:[%s1356_s1 + $0xc8] sm:$0xff]  ;;  %v1047_v31 = vld [vmem:[%s1356_s1 + $0xc0] sm:$0xff]  ;;  %v1086_v43 = vld [vmem:[%s1356_s1 + $0x1f8] sm:$0xff] }
   0xd   :  { %615 = vmatpush.bf16.msra.mxu3 %v1052_v11  ;;  %v737_v34 = vld [vmem:[%s1357_s0 + $0x8] sm:$0xf]  ;;  %v1016_v36 = vld [vmem:[%s1357_s0 + $0xc] sm:$0xf]  ;;  %v729_v38 = vld [vmem:[%s1357_s0] sm:$0xf] }
   0xe   :  { %574 = vmatpush.bf16.msra.mxu0 %v1027_v12  ;;  %v1020_v35 = vld [vmem:[%s1357_s0 + $0x24] sm:$0xf0]  ;;  %v739_v37 = vld [vmem:[%s1357_s0 + $0x28] sm:$0xf0]  ;;  %v1019_v39 = vld [vmem:[%s1357_s0 + $0x1c] sm:$0xf0] }
   0xf   :  { %588 = vmatpush.bf16.msra.mxu1 %v1035_v13  ;;  %v1015_v40 = vld [vmem:[%s1357_s0 + $0x4] sm:$0xf]  ;;  %v738_v44 = vor.u32 %v1020_v35, %v737_v34  ;;  %v742_v45 = vor.u32 %v1016_v36, %v739_v37  ;;  %v730_v46 = vor.u32 %v1019_v39, %v729_v38  ;;  %v1061_v48 = vld [vmem:[%s1356_s1 + $0x130] sm:$0xff]  ;;  %v1060_v52 = vld [vmem:[%s1356_s1 + $0x128] sm:$0xff] }
  0x10   :  { %602 = vmatpush.bf16.msra.mxu2 %v1043_v14  ;;  %v731_v41 = vld [vmem:[%s1357_s0 + $0x20] sm:$0xf0]  ;;  %v1069_v49 = vld [vmem:[%s1356_s1 + $0x170] sm:$0xff]  ;;  %v1068_v53 = vld [vmem:[%s1356_s1 + $0x168] sm:$0xff] }
  0x11   :  { %616 = vmatpush.bf16.msra.mxu3 %v1051_v15  ;;  %v734_v47 = vor.u32 %v1015_v40, %v731_v41  ;;  %v1077_v50 = vld [vmem:[%s1356_s1 + $0x1b0] sm:$0xff]  ;;  %v1076_v54 = vld [vmem:[%s1356_s1 + $0x1a8] sm:$0xff]  ;;  %v1059_v56 = vld [vmem:[%s1356_s1 + $0x120] sm:$0xff] }
  0x12   :  { %575 = vmatpush.bf16.msra.mxu0 %v1026_v16  ;;  %v1085_v51 = vld [vmem:[%s1356_s1 + $0x1f0] sm:$0xff]  ;;  %v1084_v55 = vld [vmem:[%s1356_s1 + $0x1e8] sm:$0xff]  ;;  %v1067_v57 = vld [vmem:[%s1356_s1 + $0x160] sm:$0xff] }
  0x13   :  { %589 = vmatpush.bf16.msra.mxu1 %v1034_v17  ;;  %v1075_v58 = vld [vmem:[%s1356_s1 + $0x1a0] sm:$0xff]  ;;  %v1058_v60 = vld [vmem:[%s1356_s1 + $0x118] sm:$0xff]  ;;  %v1057_v0 = vld [vmem:[%s1356_s1 + $0x110] sm:$0xff] }
  0x14   :  { %603 = vmatpush.bf16.msra.mxu2 %v1042_v18  ;;  %v1083_v59 = vld [vmem:[%s1356_s1 + $0x1e0] sm:$0xff]  ;;  %v1066_v61 = vld [vmem:[%s1356_s1 + $0x158] sm:$0xff]  ;;  %v1065_v1 = vld [vmem:[%s1356_s1 + $0x150] sm:$0xff] }
  0x15   :  { %617 = vmatpush.bf16.msra.mxu3 %v1050_v19  ;;  %v1074_v62 = vld [vmem:[%s1356_s1 + $0x198] sm:$0xff]  ;;  %v1073_v2 = vld [vmem:[%s1356_s1 + $0x190] sm:$0xff]  ;;  %v1056_v4 = vld [vmem:[%s1356_s1 + $0x108] sm:$0xff] }
  0x16   :  { %576 = vmatpush.bf16.msra.mxu0 %v1025_v20  ;;  %v1082_v63 = vld [vmem:[%s1356_s1 + $0x1d8] sm:$0xff]  ;;  %v1081_v3 = vld [vmem:[%s1356_s1 + $0x1d0] sm:$0xff]  ;;  %v1064_v5 = vld [vmem:[%s1356_s1 + $0x148] sm:$0xff] }
  0x17   :  { %590 = vmatpush.bf16.msra.mxu1 %v1033_v21  ;;  %v1072_v6 = vld [vmem:[%s1356_s1 + $0x188] sm:$0xff]  ;;  %v1055_v8 = vld [vmem:[%s1356_s1 + $0x100] sm:$0xff]  ;;  %v745_v12 = vld [vmem:[%s1357_s0 + $0x10] sm:$0xf] }
  0x18   :  { %604 = vmatpush.bf16.msra.mxu2 %v1041_v22  ;;  %v1080_v7 = vld [vmem:[%s1356_s1 + $0x1c8] sm:$0xff]  ;;  %v1063_v9 = vld [vmem:[%s1356_s1 + $0x140] sm:$0xff]  ;;  %v1021_v13 = vld [vmem:[%s1357_s0 + $0x2c] sm:$0xf0] }
  0x19   :  { %618 = vmatpush.bf16.msra.mxu3 %v1049_v23  ;;  %v1071_v10 = vld [vmem:[%s1356_s1 + $0x180] sm:$0xff]  ;;  %v1017_v14 = vld [vmem:[%s1357_s0 + $0x14] sm:$0xf]  ;;  %v753_v16 = vld [vmem:[%s1357_s0 + $0x18] sm:$0xf]  ;;  %v746_v20 = vor.u32 %v1021_v13, %v745_v12 }
  0x1a   :  { %577 = vmatpush.bf16.msra.mxu0 %v1024_v24  ;;  %v1079_v11 = vld [vmem:[%s1356_s1 + $0x1c0] sm:$0xff]  ;;  %v747_v15 = vld [vmem:[%s1357_s0 + $0x30] sm:$0xf0]  ;;  %v1022_v17 = vld [vmem:[%s1357_s0 + $0x34] sm:$0xf0] }
  0x1b   :  { %591 = vmatpush.bf16.msra.mxu1 %v1032_v25  ;;  %v1018_v18 = vld [vmem:[%s1357_s0 + $0x1c] sm:$0xf]  ;;  %v750_v21 = vor.u32 %v1017_v14, %v747_v15  ;;  %v754_v22 = vor.u32 %v1022_v17, %v753_v16 }
  0x1c   :  { %605 = vmatpush.bf16.msra.mxu2 %v1040_v26  ;;  %v755_v19 = vld [vmem:[%s1357_s0 + $0x38] sm:$0xf0] }
  0x1d   :  { %619 = vmatpush.bf16.msra.mxu3 %v1048_v27  ;;  %v758_v23 = vor.u32 %v1018_v18, %v755_v19 }
  0x1e   :  { %578 = vmatpush.bf16.msra.mxu0 %v1023_v28 }
  0x1f   :  { %592 = vmatpush.bf16.msra.mxu1 %v1031_v29 }
  0x20   :  { %606 = vmatpush.bf16.msra.mxu2 %v1039_v30 }
  0x21   :  { %620 = vmatpush.bf16.msra.mxu3 %v1047_v31  ;;  %579 = vmatmul.bf16.vlgmr.msra.gmra.mxu0 %v730_v46 }
  0x22   :  { %627 = vmatpush.bf16.msrb.mxu0 %v1062_v32  ;;  %593 = vmatmul.bf16.vlgmr.msra.gmra.mxu1 %v734_v47 }
  0x23   :  { %641 = vmatpush.bf16.msrb.mxu1 %v1070_v33  ;;  %607 = vmatmul.bf16.vlgmr.msra.gmra.mxu2 %v738_v44 }
  0x24   :  { %655 = vmatpush.bf16.msrb.mxu2 %v1078_v42  ;;  %621 = vmatmul.bf16.vlgmr.msra.gmra.mxu3 %v742_v45 }
  0x25   :  { %669 = vmatpush.bf16.msrb.mxu3 %v1086_v43 }
  0x26   :  { %628 = vmatpush.bf16.msrb.mxu0 %v1061_v48 }
  0x27   :  { %642 = vmatpush.bf16.msrb.mxu1 %v1069_v49 }
  0x28   :  { %656 = vmatpush.bf16.msrb.mxu2 %v1077_v50 }
  0x29   :  { %670 = vmatpush.bf16.msrb.mxu3 %v1085_v51 }
  0x2a   :  { %629 = vmatpush.bf16.msrb.mxu0 %v1060_v52 }
  0x2b   :  { %643 = vmatpush.bf16.msrb.mxu1 %v1068_v53 }
  0x2c   :  { %657 = vmatpush.bf16.msrb.mxu2 %v1076_v54 }
  0x2d   :  { %671 = vmatpush.bf16.msrb.mxu3 %v1084_v55 }
  0x2e   :  { %630 = vmatpush.bf16.msrb.mxu0 %v1059_v56 }
  0x2f   :  { %644 = vmatpush.bf16.msrb.mxu1 %v1067_v57 }
  0x30   :  { %658 = vmatpush.bf16.msrb.mxu2 %v1075_v58 }
  0x31   :  { %672 = vmatpush.bf16.msrb.mxu3 %v1083_v59 }
  0x32   :  { %631 = vmatpush.bf16.msrb.mxu0 %v1058_v60 }
  0x33   :  { %645 = vmatpush.bf16.msrb.mxu1 %v1066_v61 }
  0x34   :  { %659 = vmatpush.bf16.msrb.mxu2 %v1074_v62 }
  0x35   :  { %673 = vmatpush.bf16.msrb.mxu3 %v1082_v63 }
  0x36   :  { %632 = vmatpush.bf16.msrb.mxu0 %v1057_v0 }
  0x37   :  { %646 = vmatpush.bf16.msrb.mxu1 %v1065_v1 }
  0x38   :  { %660 = vmatpush.bf16.msrb.mxu2 %v1073_v2 }
  0x39   :  { %674 = vmatpush.bf16.msrb.mxu3 %v1081_v3 }
  0x3a   :  { %633 = vmatpush.bf16.msrb.mxu0 %v1056_v4 }
  0x3b   :  { %647 = vmatpush.bf16.msrb.mxu1 %v1064_v5 }
  0x3c   :  { %661 = vmatpush.bf16.msrb.mxu2 %v1072_v6 }
  0x3d   :  { %675 = vmatpush.bf16.msrb.mxu3 %v1080_v7 }
  0x3e   :  { %634 = vmatpush.bf16.msrb.mxu0 %v1055_v8 }
  0x3f   :  { %648 = vmatpush.bf16.msrb.mxu1 %v1063_v9 }
  0x40   :  { %662 = vmatpush.bf16.msrb.mxu2 %v1071_v10 }
  0x41   :  { %676 = vmatpush.bf16.msrb.mxu3 %v1079_v11  ;;  %635 = vmatmul.bf16.vlgmr.msrb.gmra.mxu0 %v746_v20 }
  0x42   :  { %649 = vmatmul.bf16.vlgmr.msrb.gmra.mxu1 %v750_v21 }
  0x43   :  { %663 = vmatmul.bf16.vlgmr.msrb.gmra.mxu2 %v754_v22 }
  0x44   :  { %677 = vmatmul.bf16.vlgmr.msrb.gmra.mxu3 %v758_v23 }
  0x9e   :  { %v580_v24 = vpop.f32.mrf.mxu0 }
  0x9f   :  { %v594_v25 = vpop.f32.mrf.mxu1 }
  0xa0   :  { %v595_v28 = vadd.f32 %v594_v25, %v580_v24 }
  0xa6   :  { %v608_v26 = vpop.f32.mrf.mxu2  ;;  %v582_v29 = vpop.f32.mrf.mxu0 }
  0xa7   :  { %v622_v27 = vpop.f32.mrf.mxu3  ;;  %v596_v30 = vpop.f32.mrf.mxu1  ;;  %v609_v31 = vadd.f32 %v608_v26, %v595_v28 }
  0xa8   :  { %v597_v35 = vadd.f32 %v596_v30, %v582_v29 }
  0xa9   :  { %v623_v34 = vadd.f32 %v622_v27, %v609_v31 }
  0xae   :  { %v610_v32 = vpop.f32.mrf.mxu2 }
  0xaf   :  { %v624_v33 = vpop.f32.mrf.mxu3  ;;  %v611_v39 = vadd.f32 %v610_v32, %v597_v35 }
  0xb1   :  { %v625_v43 = vadd.f32 %v624_v33, %v611_v39 }
  0xbe   :  { %v636_v36 = vpop.f32.mrf.mxu0 }
  0xbf   :  { %v637_v37 = vadd.f32 %v636_v36, %v623_v34  ;;  %v650_v38 = vpop.f32.mrf.mxu1 }
  0xc1   :  { %v651_v40 = vadd.f32 %v650_v38, %v637_v37 }
  0xc6   :  { %v664_v41 = vpop.f32.mrf.mxu2  ;;  %v638_v45 = vpop.f32.mrf.mxu0 }
  0xc7   :  { %v678_v42 = vpop.f32.mrf.mxu3  ;;  %v665_v44 = vadd.f32 %v664_v41, %v651_v40  ;;  %v639_v47 = vadd.f32 %v638_v45, %v625_v43  ;;  %v652_v49 = vpop.f32.mrf.mxu1 }
  0xc9   :  { %v679_v46 = vadd.f32 %v678_v42, %v665_v44  ;;  %v653_v51 = vadd.f32 %v652_v49, %v639_v47 }
  0xcb   :  { %v683_v48 = vsub.f32 0.0, %v679_v46 }
  0xcd   :  { %v685_v50 = vmul.f32 1.442695, %v683_v48 }
  0xce   :  { %v666_v52 = vpop.f32.mrf.mxu2 }
  0xcf   :  { %1087 = vpow2.f32 %v685_v50  ;;  %v667_v53 = vadd.f32 %v666_v52, %v653_v51  ;;  %v680_v54 = vpop.f32.mrf.mxu3 }
  0xd1   :  { %v681_v55 = vadd.f32 %v680_v54, %v667_v53 }
  0xd3   :  { %v684_v56 = vsub.f32 0.0, %v681_v55 }
  0xd5   :  { %v1088_v57 = vpop.eup %1087  ;;  %v687_v58 = vmul.f32 1.442695, %v684_v56 }
  0xd6   :  { %v689_v59 = vadd.f32 1.0, %v1088_v57 }
  0xd7   :  { %1089 = vpow2.f32 %v687_v58 }
  0xd8   :  { %1091 = vrcp.f32 %v689_v59  ;;  %v702_v1 = vand.u32 2147483648, %v689_v59  ;;  %v700_v3 = vand.u32 2147483647, %v689_v59  ;;  %vm696_vm1 = vweird.f32 %v689_v59 }
  0xda   :  { %v703_v6 = vor.u32 1.1754944e-38, %v702_v1  ;;  %vm701_vm3 = vcmp.eq.f32.partialorder %v700_v3, 8.507059e+37 }
  0xdd   :  { %v1090_v60 = vpop.eup %1089 }
  0xde   :  { %v1092_v61 = vpop.eup %1091  ;;  %v690_v62 = vadd.f32 1.0, %v1090_v60 }
  0xdf   :  { %v692_v63 = vmul.f32 %v1092_v61, %v689_v59  ;;  %vm697_vm0 = vweird.f32 %v1092_v61 }
  0xe0   :  { %1093 = vrcp.f32 %v690_v62  ;;  %vm698_vm2 = vmor %vm696_vm1, %vm697_vm0  ;;  %v717_v11 = vand.u32 2147483648, %v690_v62  ;;  %v715_v13 = vand.u32 2147483647, %v690_v62  ;;  %vm711_vm5 = vweird.f32 %v690_v62 }
  0xe1   :  { %v693_v0 = vsub.f32 1.0, %v692_v63 }
  0xe2   :  { %v718_v15 = vor.u32 1.1754944e-38, %v717_v11  ;;  %vm716_vm7 = vcmp.eq.f32.partialorder %v715_v13, 8.507059e+37 }
  0xe3   :  { %v694_v2 = vmul.f32 %v1092_v61, %v693_v0 }
  0xe5   :  { %v695_v4 = vadd.f32 %v1092_v61, %v694_v2 }
  0xe6   :  { %v1094_v5 = vpop.eup %1093 }
  0xe7   :  { %v699_v7 = vsel %vm698_vm2, %v1092_v61, %v695_v4  ;;  %v707_v8 = vmul.f32 %v1094_v5, %v690_v62  ;;  %vm712_vm4 = vweird.f32 %v1094_v5 }
  0xe8   :  { %v704_v9 = vsel %vm701_vm3, %v703_v6, %v699_v7  ;;  %vm713_vm6 = vmor %vm711_vm5, %vm712_vm4 }
  0xe9   :  { %721 = vst [vmem:[%s1358_s2] sm:$0xff] %v704_v9  ;;  %v708_v10 = vsub.f32 1.0, %v707_v8 }
  0xeb   :  { %v709_v12 = vmul.f32 %v1094_v5, %v708_v10 }
  0xed   :  { %v710_v14 = vadd.f32 %v1094_v5, %v709_v12 }
  0xef   :  { %v714_v16 = vsel %vm713_vm6, %v1094_v5, %v710_v14 }
  0xf0   :  { %v719_v17 = vsel %vm716_vm7, %v718_v15, %v714_v16 }
  0xf1   :  { %722 = vst [vmem:[%s1358_s2 + $0x8] sm:$0xff] %v719_v17 }

</bundles_post_ra>
